<compile_context>
chip_gen: v6e
topology: v6e:2x2x1
jax: 0.10.0
libtpu: 0.0.40
codegen_flags: <defaults>
</compile_context>

<pallas_src>
import functools
import math

import jax
import jax.numpy as jnp
from jax import lax
from jax.experimental import pallas as pl
from jax.experimental.pallas import tpu as pltpu


# ----------------------------- HW-aware tuning --------------------------------

def _tpu_vmem_capacity_bytes():
    try:
        info = pltpu.get_tpu_info()
        cap = getattr(info, "vmem_capacity_bytes", None)
        if cap:
            return int(cap)
    except Exception:
        pass
    return 64 * 1024 * 1024  # conservative fallback (v7x-sized)


_VMEM_CAP = _tpu_vmem_capacity_bytes()
# ~3/4 of physical VMEM, capped: 96 MiB on 128-MiB parts (v5e/v6e), 48 MiB on v7x.
_VMEM_LIMIT = min(int(_VMEM_CAP * 3 // 4), 112 * 1024 * 1024)

if _VMEM_CAP >= 96 * 1024 * 1024:      # v5e / v6e: 128 MiB VMEM per core
    _TM_TARGET, _TN_TARGET, _TK_TARGET = 512, 512, 1024
else:                                  # v7x: 64 MiB VMEM per core
    _TM_TARGET, _TN_TARGET, _TK_TARGET = 256, 256, 512


def _pick_tile(dim, target, align):
    """Largest tile <= target that divides `dim`, preferring `align` multiples;
    falls back to the full dim (a full-extent block is always layout-legal)."""
    if dim <= target:
        return dim
    for a in (align, max(align // 2, 1), 8):
        t = (target // a) * a
        while t >= a:
            if dim % t == 0:
                return t
            t -= a
    # TODO(synk): pad awkward dims instead of falling back to a full-extent
    # (potentially VMEM-heavy) block.
    return dim


# ----------------------------- Pallas kernels --------------------------------

def _qkv_proj_cross_kernel(xq_ref, xk_ref, xv_ref, wq_ref, wk_ref, wv_ref,
                           bq_ref, bk_ref, bv_ref,
                           oq_ref, ok_ref, ov_ref,
                           accq, acck, accv):
    """Fused (cross-attention) Q/K/V projection.  Grid = (M/tm, K/tk).

    Three separate f32 accumulators (no lane-sliced RMW); three lane-dense
    (tm, D) stores on the last K step.  Activations arrive f32 and are cast
    to bf16 in-kernel (halves projection-input HBM traffic vs a wrapper cast).
    """
    kstep = pl.program_id(1)

    @pl.when(kstep == 0)
    def _():
        accq[...] = jnp.zeros_like(accq)
        acck[...] = jnp.zeros_like(acck)
        accv[...] = jnp.zeros_like(accv)

    xq = xq_ref[...].astype(jnp.bfloat16)
    xk = xk_ref[...].astype(jnp.bfloat16)
    xv = xv_ref[...].astype(jnp.bfloat16)
    accq[...] += jnp.dot(xq, wq_ref[...], preferred_element_type=jnp.float32)
    acck[...] += jnp.dot(xk, wk_ref[...], preferred_element_type=jnp.float32)
    accv[...] += jnp.dot(xv, wv_ref[...], preferred_element_type=jnp.float32)

    @pl.when(kstep == pl.num_programs(1) - 1)
    def _():
        oq_ref[...] = (accq[...] + bq_ref[...]).astype(oq_ref.dtype)
        ok_ref[...] = (acck[...] + bk_ref[...]).astype(ok_ref.dtype)
        ov_ref[...] = (accv[...] + bv_ref[...]).astype(ov_ref.dtype)


def _qkv_proj_self_kernel(x_ref, w_ref, b_ref, oq_ref, ok_ref, ov_ref, acc_ref):
    """Self-attention fast path: one wide x @ [Wq|Wk|Wv] matmul per step.

    Grid = (M/tm, K/tk).  Single (tm, 3D) f32 accumulator, activation read
    from HBM once, finalize splits into three lane-dense (tm, D) stores.
    """
    D = oq_ref.shape[1]
    kstep = pl.program_id(1)

    @pl.when(kstep == 0)
    def _():
        acc_ref[...] = jnp.zeros_like(acc_ref)

    x = x_ref[...].astype(jnp.bfloat16)
    acc_ref[...] += jnp.dot(x, w_ref[...], preferred_element_type=jnp.float32)

    @pl.when(kstep == pl.num_programs(1) - 1)
    def _():
        y = acc_ref[...] + b_ref[...]
        oq_ref[...] = y[:, 0:D].astype(oq_ref.dtype)
        ok_ref[...] = y[:, D:2 * D].astype(ok_ref.dtype)
        ov_ref[...] = y[:, 2 * D:3 * D].astype(ov_ref.dtype)


def _linear_kernel(x_ref, w_ref, b_ref, o_ref, acc_ref):
    """Tiled y = x @ w + b.  Grid = (M/tm, N/tn, K/tk); K is the reduction."""
    kstep = pl.program_id(2)

    @pl.when(kstep == 0)
    def _():
        acc_ref[...] = jnp.zeros_like(acc_ref)

    acc_ref[...] += jnp.dot(x_ref[...].astype(jnp.bfloat16), w_ref[...],
                            preferred_element_type=jnp.float32)

    @pl.when(kstep == pl.num_programs(2) - 1)
    def _():
        o_ref[...] = (acc_ref[...] + b_ref[...]).astype(o_ref.dtype)


def _attn_kernel(q_ref, k_ref, v_ref, o_ref, acc_ref, *, num_heads, d_k):
    """Attention for one batch element.  q/k/v refs: (S, D) bf16.

    The 1/sqrt(d_k) scale is already folded into the Q projection weights.
    Each head's result is written into an (S, D) f32 VMEM scratch slice; the
    output is emitted with a single lane-dense store.
    """
    for h in range(num_heads):
        lo = h * d_k
        q = q_ref[:, lo:lo + d_k]
        k = k_ref[:, lo:lo + d_k]
        v = v_ref[:, lo:lo + d_k]

        # scores = q @ k^T without an explicit transpose: contract last dims.
        s = lax.dot_general(q, k,
                            dimension_numbers=(((1,), (1,)), ((), ())),
                            preferred_element_type=jnp.float32)

        # softmax(s) followed by the module quirk "subtract per-row max of the
        # softmax probs".  With m the row max, rowmax(exp(s - m)) == 1, hence
        # rowmax(softmax) == 1/l and the result equals (exp(s - m) - 1) / l.
        m = jnp.max(s, axis=-1, keepdims=True)
        e = jnp.exp(s - m)
        l = jnp.sum(e, axis=-1, keepdims=True)
        p = (e - 1.0) * pl.reciprocal(l, approx=True)

        acc_ref[:, lo:lo + d_k] = jnp.dot(p.astype(v.dtype), v,
                                          preferred_element_type=jnp.float32)

    o_ref[...] = acc_ref[...].astype(o_ref.dtype)


# ------------------------------ Wrappers --------------------------------------

def pallas_qkv_proj_cross(xq, xk, xv, wq, wk, wv, bq, bk, bv,
                          *, out_dtype=jnp.bfloat16):
    """xq/xk/xv: (M, K) f32; wq/wk/wv: (K, D) bf16; bq/bk/bv: (1, D) f32."""
    M, K = xq.shape
    D = wq.shape[1]
    tm = _pick_tile(M, _TM_TARGET, 16)
    tk = _pick_tile(K, _TK_TARGET, 256)
    x_spec = pl.BlockSpec((tm, tk), lambda i, ks: (i, ks))
    w_spec = pl.BlockSpec((tk, D), lambda i, ks: (ks, 0))
    b_spec = pl.BlockSpec((1, D), lambda i, ks: (0, 0))
    o_spec = pl.BlockSpec((tm, D), lambda i, ks: (i, 0))
    out_sds = jax.ShapeDtypeStruct((M, D), out_dtype)
    return pl.pallas_call(
        _qkv_proj_cross_kernel,
        out_shape=(out_sds, out_sds, out_sds),
        grid=(M // tm, K // tk),
        in_specs=[x_spec, x_spec, x_spec, w_spec, w_spec, w_spec,
                  b_spec, b_spec, b_spec],
        out_specs=(o_spec, o_spec, o_spec),
        scratch_shapes=[pltpu.VMEM((tm, D), jnp.float32) for _ in range(3)],
        compiler_params=pltpu.CompilerParams(
            dimension_semantics=("parallel", "arbitrary"),
            vmem_limit_bytes=_VMEM_LIMIT,
        ),
    )(xq, xk, xv, wq, wk, wv, bq, bk, bv)


def pallas_qkv_proj_self(x, w_qkv, b_qkv, *, out_dtype=jnp.bfloat16):
    """x: (M, K) f32; w_qkv: (K, 3D) bf16; b_qkv: (1, 3D) f32."""
    M, K = x.shape
    threeD = w_qkv.shape[1]
    D = threeD // 3
    tm = _pick_tile(M, _TM_TARGET, 16)
    tk = _pick_tile(K, _TK_TARGET, 256)
    o_spec = pl.BlockSpec((tm, D), lambda i, ks: (i, 0))
    out_sds = jax.ShapeDtypeStruct((M, D), out_dtype)
    return pl.pallas_call(
        _qkv_proj_self_kernel,
        out_shape=(out_sds, out_sds, out_sds),
        grid=(M // tm, K // tk),
        in_specs=[pl.BlockSpec((tm, tk), lambda i, ks: (i, ks)),
                  pl.BlockSpec((tk, threeD), lambda i, ks: (ks, 0)),
                  pl.BlockSpec((1, threeD), lambda i, ks: (0, 0))],
        out_specs=(o_spec, o_spec, o_spec),
        scratch_shapes=[pltpu.VMEM((tm, threeD), jnp.float32)],
        compiler_params=pltpu.CompilerParams(
            dimension_semantics=("parallel", "arbitrary"),
            vmem_limit_bytes=_VMEM_LIMIT,
        ),
    )(x, w_qkv, b_qkv)


def pallas_linear(x2d, w, b2d, *, out_dtype):
    """x2d: (M, K); w: (K, N) bf16; b2d: (1, N) f32 -> (M, N) out_dtype."""
    M, K = x2d.shape
    N = w.shape[1]
    tm = _pick_tile(M, _TM_TARGET, 16)
    tn = _pick_tile(N, _TN_TARGET, 256)
    tk = _pick_tile(K, _TK_TARGET, 256)
    return pl.pallas_call(
        _linear_kernel,
        out_shape=jax.ShapeDtypeStruct((M, N), out_dtype),
        grid=(M // tm, N // tn, K // tk),
        in_specs=[
            pl.BlockSpec((tm, tk), lambda i, j, ks: (i, ks)),
            pl.BlockSpec((tk, tn), lambda i, j, ks: (ks, j)),
            pl.BlockSpec((1, tn), lambda i, j, ks: (0, j)),
        ],
        out_specs=pl.BlockSpec((tm, tn), lambda i, j, ks: (i, j)),
        scratch_shapes=[pltpu.VMEM((tm, tn), jnp.float32)],
        compiler_params=pltpu.CompilerParams(
            dimension_semantics=("parallel", "parallel", "arbitrary"),
            vmem_limit_bytes=_VMEM_LIMIT,
        ),
    )(x2d, w, b2d)


def pallas_attention(q, k, v, *, num_heads, d_k):
    """q/k/v: (B, S, D) bf16 -> (B, S, D) bf16.  Grid over batch."""
    B, S, D = q.shape
    kernel = functools.partial(_attn_kernel, num_heads=num_heads, d_k=d_k)
    in_spec = pl.BlockSpec((None, S, D), lambda b: (b, 0, 0))
    out_spec = pl.BlockSpec((None, S, D), lambda b: (b, 0, 0))
    ce = pl.CostEstimate(
        flops=4 * B * S * S * D,
        transcendentals=B * num_heads * S * S,
        bytes_accessed=2 * (3 * B * S * D + B * S * D),
    )
    return pl.pallas_call(
        kernel,
        out_shape=jax.ShapeDtypeStruct((B, S, D), jnp.bfloat16),
        grid=(B,),
        in_specs=[in_spec, in_spec, in_spec],
        out_specs=out_spec,
        scratch_shapes=[pltpu.VMEM((S, D), jnp.float32)],
        compiler_params=pltpu.CompilerParams(
            dimension_semantics=("parallel",),
            vmem_limit_bytes=_VMEM_LIMIT,
        ),
        cost_estimate=ce,
    )(q, k, v)


# ------------------------------ Model -----------------------------------------

def init_params(key, d_model, num_heads):
    """PyTorch-Linear-style uniform init.  Weights stored (Din, Dout) bf16 (MXU
    operands), biases f32.  The 1/sqrt(d_k) attention scale is folded into the
    Q projection (exact one-time transform).  A packed [Wq|Wk|Wv] copy is kept
    for the self-attention fast path."""
    bound = 1.0 / math.sqrt(d_model)
    d_k = d_model // num_heads
    scale = 1.0 / math.sqrt(d_k)
    keys = jax.random.split(key, 8)

    def lin(kw, kb):
        w = jax.random.uniform(kw, (d_model, d_model), jnp.float32, -bound, bound)
        b = jax.random.uniform(kb, (d_model,), jnp.float32, -bound, bound)
        return w, b

    wq, bq = lin(keys[0], keys[1])
    wk, bk = lin(keys[2], keys[3])
    wv, bv = lin(keys[4], keys[5])
    wo, bo = lin(keys[6], keys[7])

    # Fold the softmax scale: scores = (x Wq s + bq s) @ (x Wk + bk)^T.
    wq = wq * scale
    bq = bq * scale

    params = dict(
        wq=wq.astype(jnp.bfloat16), bq=bq,
        wk=wk.astype(jnp.bfloat16), bk=bk,
        wv=wv.astype(jnp.bfloat16), bv=bv,
        wo=wo.astype(jnp.bfloat16), bo=bo,
    )
    params["w_qkv"] = jnp.concatenate(
        [params["wq"], params["wk"], params["wv"]], axis=1)
    params["b_qkv"] = jnp.concatenate([bq, bk, bv]).reshape(1, 3 * d_model)
    return params


@functools.partial(jax.jit,
                   static_argnames=("num_heads", "self_attn", "out_dtype"))
def _mha_forward(params, q, k, v, num_heads, self_attn, out_dtype):
    B, S, D = q.shape
    d_k = D // num_heads

    xq = q.reshape(B * S, D)  # f32; bf16 cast happens inside the kernels
    if self_attn:
        q_p, k_p, v_p = pallas_qkv_proj_self(xq, params["w_qkv"],
                                             params["b_qkv"])
    else:
        xk = k.reshape(B * S, D)
        xv = v.reshape(B * S, D)
        q_p, k_p, v_p = pallas_qkv_proj_cross(
            xq, xk, xv, params["wq"], params["wk"], params["wv"],
            params["bq"].reshape(1, D), params["bk"].reshape(1, D),
            params["bv"].reshape(1, D))

    q_p = q_p.reshape(B, S, D)
    k_p = k_p.reshape(B, S, D)
    v_p = v_p.reshape(B, S, D)

    attn = pallas_attention(q_p, k_p, v_p, num_heads=num_heads, d_k=d_k)

    out = pallas_linear(attn.reshape(B * S, D), params["wo"],
                        params["bo"].reshape(1, D), out_dtype=out_dtype)
    return out.reshape(B, S, D)


def multi_head_attention_forward(params, q, k, v, num_heads, mask=None,
                                 out_dtype=jnp.float32):
    """Forward pass matching MultiHeadAttention.forward (mask=None only)."""
    # TODO(synk): attn_mask / key_padding_mask not implemented.
    if mask is not None:
        raise NotImplementedError("mask is not supported by the Pallas kernels")
    self_attn = (q is k) and (k is v)
    return _mha_forward(params, q, k, v, num_heads=num_heads,
                        self_attn=self_attn, out_dtype=out_dtype)


# ------------------------------ Pure-JAX reference -----------------------------

def _reference_forward(params, q, k, v, num_heads):
    """f32 reference mirroring the PyTorch module (scale already in Wq/bq)."""
    B, S, D = q.shape
    d_k = D // num_heads

    def lin(x, w, b):
        return x @ w.astype(jnp.float32) + b.astype(jnp.float32)

    def split(x):
        return x.reshape(B, S, num_heads, d_k).transpose(0, 2, 1, 3)

    qh = split(lin(q, params["wq"], params["bq"]))
    kh = split(lin(k, params["wk"], params["bk"]))
    vh = split(lin(v, params["wv"], params["bv"]))
    s = jnp.einsum("bhqd,bhkd->bhqk", qh, kh)
    p = jax.nn.softmax(s, axis=-1)
    p = p - jnp.max(p, axis=-1, keepdims=True)
    o = jnp.einsum("bhqk,bhkd->bhqd", p, vh)
    o = o.transpose(0, 2, 1, 3).reshape(B, S, D)
    return o @ params["wo"].astype(jnp.float32) + params["bo"].astype(jnp.float32)


# --------------------------------- Main ----------------------------------------

if __name__ == "__main__":
    d_model = 32
    num_heads = 4
    batch = 2
    seq = 8

    key = jax.random.PRNGKey(0)
    kp, kq, kk, kv = jax.random.split(key, 4)

    params = init_params(kp, d_model, num_heads)
    q = jax.random.normal(kq, (batch, seq, d_model), jnp.float32)
    k = jax.random.normal(kk, (batch, seq, d_model), jnp.float32)
    v = jax.random.normal(kv, (batch, seq, d_model), jnp.float32)

    # Cross-attention path (distinct q / k / v).
    out = multi_head_attention_forward(params, q, k, v, num_heads)
    jax.block_until_ready(out)
    assert out.shape == (batch, seq, d_model), out.shape
    assert bool(jnp.all(jnp.isfinite(out))), "non-finite output (cross)"
    ref = _reference_forward(params, q, k, v, num_heads)
    err = float(jnp.max(jnp.abs(out - ref)))
    assert err < 5e-2, f"cross-attention mismatch vs reference: {err}"

    # Self-attention fast path (q is k is v -> packed single-matmul QKV).
    out_self = multi_head_attention_forward(params, q, q, q, num_heads)
    jax.block_until_ready(out_self)
    assert out_self.shape == (batch, seq, d_model), out_self.shape
    assert bool(jnp.all(jnp.isfinite(out_self))), "non-finite output (self)"
    ref_self = _reference_forward(params, q, q, q, num_heads)
    err_self = float(jnp.max(jnp.abs(out_self - ref_self)))
    assert err_self < 5e-2, f"self-attention mismatch vs reference: {err_self}"

    print("KERNEL_OK")
</pallas_src>

<mosaic_0001>
module attributes {stable_mosaic.version = 11 : i64} {
  func.func @_linear_kernel(%arg0: i32, %arg1: i32, %arg2: i32, %arg3: memref<16x32xbf16, #tpu.memory_space<vmem>>, %arg4: memref<32x32xbf16, #tpu.memory_space<vmem>>, %arg5: memref<1x32xf32, #tpu.memory_space<vmem>>, %arg6: memref<16x32xf32, #tpu.memory_space<vmem>>, %arg7: memref<16x32xf32, #tpu.memory_space<vmem>>) attributes {dimension_semantics = [#tpu.dimension_semantics<parallel>, #tpu.dimension_semantics<parallel>, #tpu.dimension_semantics<arbitrary>], iteration_bounds = array<i64: 1, 1, 1>, scalar_prefetch = 0 : i64, scratch_operands = 1 : i64, tpu.core_type = #tpu.core_type<tc>, window_params = [{transform_indices = @transform_0, window_bounds = array<i64: 16, 32>}, {transform_indices = @transform_1, window_bounds = array<i64: 32, 32>}, {transform_indices = @transform_2, window_bounds = array<i64: 1, 32>}, {transform_indices = @transform_3, window_bounds = array<i64: 16, 32>}]} {
    %c0_i32 = arith.constant 0 : i32
    %0 = arith.cmpi eq, %arg2, %c0_i32 : i32
    %1 = arith.extui %0 : i1 to i32
    %c0_i32_0 = arith.constant 0 : i32
    %2 = arith.cmpi ne, %1, %c0_i32_0 : i32
    scf.if %2 {
      %cst_10 = arith.constant 0.000000e+00 : f32
      %12 = vector.broadcast %cst_10 : f32 to vector<16x32xf32>
      %c0_11 = arith.constant 0 : index
      %c0_12 = arith.constant 0 : index
      %13 = vector.load %arg7[%c0_11, %c0_12] : memref<16x32xf32, #tpu.memory_space<vmem>>, vector<16x32xf32>
      tpu.vector_store %arg7[%c0_11, %c0_12], %12 {strides = array<i32>} : memref<16x32xf32, #tpu.memory_space<vmem>>, vector<16x32xf32>,
    } else {
    }
    %c0 = arith.constant 0 : index
    %c0_1 = arith.constant 0 : index
    %3 = vector.load %arg7[%c0, %c0_1] : memref<16x32xf32, #tpu.memory_space<vmem>>, vector<16x32xf32>
    %c0_2 = arith.constant 0 : index
    %c0_3 = arith.constant 0 : index
    %4 = vector.load %arg3[%c0_2, %c0_3] : memref<16x32xbf16, #tpu.memory_space<vmem>>, vector<16x32xbf16>
    %c0_4 = arith.constant 0 : index
    %c0_5 = arith.constant 0 : index
    %5 = vector.load %arg4[%c0_4, %c0_5] : memref<32x32xbf16, #tpu.memory_space<vmem>>, vector<32x32xbf16>
    %cst = arith.constant dense<0.000000e+00> : vector<16x32xf32>
    %6 = tpu.matmul %4, %5, %cst {dimension_numbers = #tpu.dot_dimension_numbers<[1], [0], [0], [1], [0, 0, 1, 1], [], []>} : vector<16x32xbf16>, vector<32x32xbf16>, vector<16x32xf32> -> vector<16x32xf32>
    %7 = arith.addf %3, %6 : vector<16x32xf32>
    %c0_6 = arith.constant 0 : index
    %c0_7 = arith.constant 0 : index
    %8 = vector.load %arg7[%c0_6, %c0_7] : memref<16x32xf32, #tpu.memory_space<vmem>>, vector<16x32xf32>
    tpu.vector_store %arg7[%c0_6, %c0_7], %7 {strides = array<i32>} : memref<16x32xf32, #tpu.memory_space<vmem>>, vector<16x32xf32>,
    %c0_i32_8 = arith.constant 0 : i32
    %9 = arith.cmpi eq, %arg2, %c0_i32_8 : i32
    %10 = arith.extui %9 : i1 to i32
    %c0_i32_9 = arith.constant 0 : i32
    %11 = arith.cmpi ne, %10, %c0_i32_9 : i32
    scf.if %11 {
      %c0_10 = arith.constant 0 : index
      %c0_11 = arith.constant 0 : index
      %12 = vector.load %arg7[%c0_10, %c0_11] : memref<16x32xf32, #tpu.memory_space<vmem>>, vector<16x32xf32>
      %c0_12 = arith.constant 0 : index
      %c0_13 = arith.constant 0 : index
      %13 = vector.load %arg5[%c0_12, %c0_13] : memref<1x32xf32, #tpu.memory_space<vmem>>, vector<1x32xf32>
      %14 = vector.broadcast %13 : vector<1x32xf32> to vector<16x32xf32>
      %15 = arith.addf %12, %14 : vector<16x32xf32>
      %c0_14 = arith.constant 0 : index
      %c0_15 = arith.constant 0 : index
      %16 = vector.load %arg6[%c0_14, %c0_15] : memref<16x32xf32, #tpu.memory_space<vmem>>, vector<16x32xf32>
      tpu.vector_store %arg6[%c0_14, %c0_15], %15 {strides = array<i32>} : memref<16x32xf32, #tpu.memory_space<vmem>>, vector<16x32xf32>,
    } else {
    }
    return
  }
  func.func @transform_0(%arg0: i32, %arg1: i32, %arg2: i32) -> (i32, i32) {
    %c0_i32 = arith.constant 0 : i32
    return %arg0, %arg2 : i32, i32
  }
  func.func @transform_1(%arg0: i32, %arg1: i32, %arg2: i32) -> (i32, i32) {
    %c0_i32 = arith.constant 0 : i32
    return %arg2, %arg1 : i32, i32
  }
  func.func @transform_2(%arg0: i32, %arg1: i32, %arg2: i32) -> (i32, i32) {
    %c0_i32 = arith.constant 0 : i32
    %c0_i32_0 = arith.constant 0 : i32
    return %c0_i32, %arg1 : i32, i32
  }
  func.func @transform_3(%arg0: i32, %arg1: i32, %arg2: i32) -> (i32, i32) {
    %c0_i32 = arith.constant 0 : i32
    return %arg0, %arg1 : i32, i32
  }
}

module attributes {stable_mosaic.version = 11 : i64} {
  func.func @_attn_kernel(%arg0: i32, %arg1: memref<1x8x32xbf16, #tpu.memory_space<vmem>>, %arg2: memref<1x8x32xbf16, #tpu.memory_space<vmem>>, %arg3: memref<1x8x32xbf16, #tpu.memory_space<vmem>>, %arg4: memref<1x8x32xbf16, #tpu.memory_space<vmem>>, %arg5: memref<8x32xf32, #tpu.memory_space<vmem>>) attributes {dimension_semantics = [#tpu.dimension_semantics<parallel>], iteration_bounds = array<i64: 2>, scalar_prefetch = 0 : i64, scratch_operands = 1 : i64, tpu.core_type = #tpu.core_type<tc>, window_params = [{transform_indices = @transform_0, window_bounds = array<i64: 1, 8, 32>}, {transform_indices = @transform_1, window_bounds = array<i64: 1, 8, 32>}, {transform_indices = @transform_2, window_bounds = array<i64: 1, 8, 32>}, {transform_indices = @transform_3, window_bounds = array<i64: 1, 8, 32>}]} {
    %c0 = arith.constant 0 : index
    %c0_0 = arith.constant 0 : index
    %c0_1 = arith.constant 0 : index
    %0 = vector.load %arg1[%c0, %c0_0, %c0_1] : memref<1x8x32xbf16, #tpu.memory_space<vmem>>, vector<1x8x8xbf16>
    %1 = vector.shape_cast %0 : vector<1x8x8xbf16> to vector<8x8xbf16>
    %c0_2 = arith.constant 0 : index
    %c0_3 = arith.constant 0 : index
    %c0_4 = arith.constant 0 : index
    %2 = vector.load %arg2[%c0_2, %c0_3, %c0_4] : memref<1x8x32xbf16, #tpu.memory_space<vmem>>, vector<1x8x8xbf16>
    %3 = vector.shape_cast %2 : vector<1x8x8xbf16> to vector<8x8xbf16>
    %c0_5 = arith.constant 0 : index
    %c0_6 = arith.constant 0 : index
    %c0_7 = arith.constant 0 : index
    %4 = vector.load %arg3[%c0_5, %c0_6, %c0_7] : memref<1x8x32xbf16, #tpu.memory_space<vmem>>, vector<1x8x8xbf16>
    %5 = vector.shape_cast %4 : vector<1x8x8xbf16> to vector<8x8xbf16>
    %cst = arith.constant dense<0.000000e+00> : vector<8x8xf32>
    %6 = tpu.matmul %1, %3, %cst {dimension_numbers = #tpu.dot_dimension_numbers<[1], [1], [0], [0], [0, 0, 1, 0], [], []>} : vector<8x8xbf16>, vector<8x8xbf16>, vector<8x8xf32> -> vector<8x8xf32>
    %cst_8 = arith.constant dense<0xFF800000> : vector<8xf32>
    %7 = vector.multi_reduction <maximumf>, %6, %cst_8 [1] : vector<8x8xf32> to vector<8xf32>
    %8 = vector.shape_cast %7 : vector<8xf32> to vector<8x1xf32>
    %9 = vector.broadcast %8 : vector<8x1xf32> to vector<8x8xf32>
    %10 = arith.subf %6, %9 : vector<8x8xf32>
    %11 = math.exp %10 : vector<8x8xf32>
    %cst_9 = arith.constant dense<0.000000e+00> : vector<8xf32>
    %12 = vector.multi_reduction <add>, %11, %cst_9 [1] : vector<8x8xf32> to vector<8xf32>
    %13 = vector.shape_cast %12 : vector<8xf32> to vector<8x1xf32>
    %cst_10 = arith.constant 1.000000e+00 : f32
    %14 = vector.broadcast %cst_10 : f32 to vector<8x8xf32>
    %15 = arith.subf %11, %14 : vector<8x8xf32>
    %16 = tpu.reciprocal %13 {approx = true} : vector<8x1xf32> -> vector<8x1xf32>
    %17 = vector.broadcast %16 : vector<8x1xf32> to vector<8x8xf32>
    %18 = arith.mulf %15, %17 : vector<8x8xf32>
    %19 = arith.truncf %18 : vector<8x8xf32> to vector<8x8xbf16>
    %cst_11 = arith.constant dense<0.000000e+00> : vector<8x8xf32>
    %20 = tpu.matmul %19, %5, %cst_11 {dimension_numbers = #tpu.dot_dimension_numbers<[1], [0], [0], [1], [0, 0, 1, 1], [], []>} : vector<8x8xbf16>, vector<8x8xbf16>, vector<8x8xf32> -> vector<8x8xf32>
    %c0_12 = arith.constant 0 : index
    %c0_13 = arith.constant 0 : index
    %21 = vector.load %arg5[%c0_12, %c0_13] : memref<8x32xf32, #tpu.memory_space<vmem>>, vector<8x8xf32>
    tpu.vector_store %arg5[%c0_12, %c0_13], %20 {strides = array<i32>} : memref<8x32xf32, #tpu.memory_space<vmem>>, vector<8x8xf32>,
    %c0_14 = arith.constant 0 : index
    %c0_15 = arith.constant 0 : index
    %c8 = arith.constant 8 : index
    %22 = vector.load %arg1[%c0_14, %c0_15, %c8] : memref<1x8x32xbf16, #tpu.memory_space<vmem>>, vector<1x8x8xbf16>
    %23 = vector.shape_cast %22 : vector<1x8x8xbf16> to vector<8x8xbf16>
    %c0_16 = arith.constant 0 : index
    %c0_17 = arith.constant 0 : index
    %c8_18 = arith.constant 8 : index
    %24 = vector.load %arg2[%c0_16, %c0_17, %c8_18] : memref<1x8x32xbf16, #tpu.memory_space<vmem>>, vector<1x8x8xbf16>
    %25 = vector.shape_cast %24 : vector<1x8x8xbf16> to vector<8x8xbf16>
    %c0_19 = arith.constant 0 : index
    %c0_20 = arith.constant 0 : index
    %c8_21 = arith.constant 8 : index
    %26 = vector.load %arg3[%c0_19, %c0_20, %c8_21] : memref<1x8x32xbf16, #tpu.memory_space<vmem>>, vector<1x8x8xbf16>
    %27 = vector.shape_cast %26 : vector<1x8x8xbf16> to vector<8x8xbf16>
    %cst_22 = arith.constant dense<0.000000e+00> : vector<8x8xf32>
    %28 = tpu.matmul %23, %25, %cst_22 {dimension_numbers = #tpu.dot_dimension_numbers<[1], [1], [0], [0], [0, 0, 1, 0], [], []>} : vector<8x8xbf16>, vector<8x8xbf16>, vector<8x8xf32> -> vector<8x8xf32>
    %cst_23 = arith.constant dense<0xFF800000> : vector<8xf32>
    %29 = vector.multi_reduction <maximumf>, %28, %cst_23 [1] : vector<8x8xf32> to vector<8xf32>
    %30 = vector.shape_cast %29 : vector<8xf32> to vector<8x1xf32>
    %31 = vector.broadcast %30 : vector<8x1xf32> to vector<8x8xf32>
    %32 = arith.subf %28, %31 : vector<8x8xf32>
    %33 = math.exp %32 : vector<8x8xf32>
    %cst_24 = arith.constant dense<0.000000e+00> : vector<8xf32>
    %34 = vector.multi_reduction <add>, %33, %cst_24 [1] : vector<8x8xf32> to vector<8xf32>
    %35 = vector.shape_cast %34 : vector<8xf32> to vector<8x1xf32>
    %cst_25 = arith.constant 1.000000e+00 : f32
    %36 = vector.broadcast %cst_25 : f32 to vector<8x8xf32>
    %37 = arith.subf %33, %36 : vector<8x8xf32>
    %38 = tpu.reciprocal %35 {approx = true} : vector<8x1xf32> -> vector<8x1xf32>
    %39 = vector.broadcast %38 : vector<8x1xf32> to vector<8x8xf32>
    %40 = arith.mulf %37, %39 : vector<8x8xf32>
    %41 = arith.truncf %40 : vector<8x8xf32> to vector<8x8xbf16>
    %cst_26 = arith.constant dense<0.000000e+00> : vector<8x8xf32>
    %42 = tpu.matmul %41, %27, %cst_26 {dimension_numbers = #tpu.dot_dimension_numbers<[1], [0], [0], [1], [0, 0, 1, 1], [], []>} : vector<8x8xbf16>, vector<8x8xbf16>, vector<8x8xf32> -> vector<8x8xf32>
    %c0_27 = arith.constant 0 : index
    %c8_28 = arith.constant 8 : index
    %43 = vector.load %arg5[%c0_27, %c8_28] : memref<8x32xf32, #tpu.memory_space<vmem>>, vector<8x8xf32>
    tpu.vector_store %arg5[%c0_27, %c8_28], %42 {strides = array<i32>} : memref<8x32xf32, #tpu.memory_space<vmem>>, vector<8x8xf32>,
    %c0_29 = arith.constant 0 : index
    %c0_30 = arith.constant 0 : index
    %c16 = arith.constant 16 : index
    %44 = vector.load %arg1[%c0_29, %c0_30, %c16] : memref<1x8x32xbf16, #tpu.memory_space<vmem>>, vector<1x8x8xbf16>
    %45 = vector.shape_cast %44 : vector<1x8x8xbf16> to vector<8x8xbf16>
    %c0_31 = arith.constant 0 : index
    %c0_32 = arith.constant 0 : index
    %c16_33 = arith.constant 16 : index
    %46 = vector.load %arg2[%c0_31, %c0_32, %c16_33] : memref<1x8x32xbf16, #tpu.memory_space<vmem>>, vector<1x8x8xbf16>
    %47 = vector.shape_cast %46 : vector<1x8x8xbf16> to vector<8x8xbf16>
    %c0_34 = arith.constant 0 : index
    %c0_35 = arith.constant 0 : index
    %c16_36 = arith.constant 16 : index
    %48 = vector.load %arg3[%c0_34, %c0_35, %c16_36] : memref<1x8x32xbf16, #tpu.memory_space<vmem>>, vector<1x8x8xbf16>
    %49 = vector.shape_cast %48 : vector<1x8x8xbf16> to vector<8x8xbf16>
    %cst_37 = arith.constant dense<0.000000e+00> : vector<8x8xf32>
    %50 = tpu.matmul %45, %47, %cst_37 {dimension_numbers = #tpu.dot_dimension_numbers<[1], [1], [0], [0], [0, 0, 1, 0], [], []>} : vector<8x8xbf16>, vector<8x8xbf16>, vector<8x8xf32> -> vector<8x8xf32>
    %cst_38 = arith.constant dense<0xFF800000> : vector<8xf32>
    %51 = vector.multi_reduction <maximumf>, %50, %cst_38 [1] : vector<8x8xf32> to vector<8xf32>
    %52 = vector.shape_cast %51 : vector<8xf32> to vector<8x1xf32>
    %53 = vector.broadcast %52 : vector<8x1xf32> to vector<8x8xf32>
    %54 = arith.subf %50, %53 : vector<8x8xf32>
    %55 = math.exp %54 : vector<8x8xf32>
    %cst_39 = arith.constant dense<0.000000e+00> : vector<8xf32>
    %56 = vector.multi_reduction <add>, %55, %cst_39 [1] : vector<8x8xf32> to vector<8xf32>
    %57 = vector.shape_cast %56 : vector<8xf32> to vector<8x1xf32>
    %cst_40 = arith.constant 1.000000e+00 : f32
    %58 = vector.broadcast %cst_40 : f32 to vector<8x8xf32>
    %59 = arith.subf %55, %58 : vector<8x8xf32>
    %60 = tpu.reciprocal %57 {approx = true} : vector<8x1xf32> -> vector<8x1xf32>
    %61 = vector.broadcast %60 : vector<8x1xf32> to vector<8x8xf32>
    %62 = arith.mulf %59, %61 : vector<8x8xf32>
    %63 = arith.truncf %62 : vector<8x8xf32> to vector<8x8xbf16>
    %cst_41 = arith.constant dense<0.000000e+00> : vector<8x8xf32>
    %64 = tpu.matmul %63, %49, %cst_41 {dimension_numbers = #tpu.dot_dimension_numbers<[1], [0], [0], [1], [0, 0, 1, 1], [], []>} : vector<8x8xbf16>, vector<8x8xbf16>, vector<8x8xf32> -> vector<8x8xf32>
    %c0_42 = arith.constant 0 : index
    %c16_43 = arith.constant 16 : index
    %65 = vector.load %arg5[%c0_42, %c16_43] : memref<8x32xf32, #tpu.memory_space<vmem>>, vector<8x8xf32>
    tpu.vector_store %arg5[%c0_42, %c16_43], %64 {strides = array<i32>} : memref<8x32xf32, #tpu.memory_space<vmem>>, vector<8x8xf32>,
    %c0_44 = arith.constant 0 : index
    %c0_45 = arith.constant 0 : index
    %c24 = arith.constant 24 : index
    %66 = vector.load %arg1[%c0_44, %c0_45, %c24] : memref<1x8x32xbf16, #tpu.memory_space<vmem>>, vector<1x8x8xbf16>
    %67 = vector.shape_cast %66 : vector<1x8x8xbf16> to vector<8x8xbf16>
    %c0_46 = arith.constant 0 : index
    %c0_47 = arith.constant 0 : index
    %c24_48 = arith.constant 24 : index
    %68 = vector.load %arg2[%c0_46, %c0_47, %c24_48] : memref<1x8x32xbf16, #tpu.memory_space<vmem>>, vector<1x8x8xbf16>
    %69 = vector.shape_cast %68 : vector<1x8x8xbf16> to vector<8x8xbf16>
    %c0_49 = arith.constant 0 : index
    %c0_50 = arith.constant 0 : index
    %c24_51 = arith.constant 24 : index
    %70 = vector.load %arg3[%c0_49, %c0_50, %c24_51] : memref<1x8x32xbf16, #tpu.memory_space<vmem>>, vector<1x8x8xbf16>
    %71 = vector.shape_cast %70 : vector<1x8x8xbf16> to vector<8x8xbf16>
    %cst_52 = arith.constant dense<0.000000e+00> : vector<8x8xf32>
    %72 = tpu.matmul %67, %69, %cst_52 {dimension_numbers = #tpu.dot_dimension_numbers<[1], [1], [0], [0], [0, 0, 1, 0], [], []>} : vector<8x8xbf16>, vector<8x8xbf16>, vector<8x8xf32> -> vector<8x8xf32>
    %cst_53 = arith.constant dense<0xFF800000> : vector<8xf32>
    %73 = vector.multi_reduction <maximumf>, %72, %cst_53 [1] : vector<8x8xf32> to vector<8xf32>
    %74 = vector.shape_cast %73 : vector<8xf32> to vector<8x1xf32>
    %75 = vector.broadcast %74 : vector<8x1xf32> to vector<8x8xf32>
    %76 = arith.subf %72, %75 : vector<8x8xf32>
    %77 = math.exp %76 : vector<8x8xf32>
    %cst_54 = arith.constant dense<0.000000e+00> : vector<8xf32>
    %78 = vector.multi_reduction <add>, %77, %cst_54 [1] : vector<8x8xf32> to vector<8xf32>
    %79 = vector.shape_cast %78 : vector<8xf32> to vector<8x1xf32>
    %cst_55 = arith.constant 1.000000e+00 : f32
    %80 = vector.broadcast %cst_55 : f32 to vector<8x8xf32>
    %81 = arith.subf %77, %80 : vector<8x8xf32>
    %82 = tpu.reciprocal %79 {approx = true} : vector<8x1xf32> -> vector<8x1xf32>
    %83 = vector.broadcast %82 : vector<8x1xf32> to vector<8x8xf32>
    %84 = arith.mulf %81, %83 : vector<8x8xf32>
    %85 = arith.truncf %84 : vector<8x8xf32> to vector<8x8xbf16>
    %cst_56 = arith.constant dense<0.000000e+00> : vector<8x8xf32>
    %86 = tpu.matmul %85, %71, %cst_56 {dimension_numbers = #tpu.dot_dimension_numbers<[1], [0], [0], [1], [0, 0, 1, 1], [], []>} : vector<8x8xbf16>, vector<8x8xbf16>, vector<8x8xf32> -> vector<8x8xf32>
    %c0_57 = arith.constant 0 : index
    %c24_58 = arith.constant 24 : index
    %87 = vector.load %arg5[%c0_57, %c24_58] : memref<8x32xf32, #tpu.memory_space<vmem>>, vector<8x8xf32>
    tpu.vector_store %arg5[%c0_57, %c24_58], %86 {strides = array<i32>} : memref<8x32xf32, #tpu.memory_space<vmem>>, vector<8x8xf32>,
    %c0_59 = arith.constant 0 : index
    %c0_60 = arith.constant 0 : index
    %88 = vector.load %arg5[%c0_59, %c0_60] : memref<8x32xf32, #tpu.memory_space<vmem>>, vector<8x32xf32>
    %89 = arith.truncf %88 : vector<8x32xf32> to vector<8x32xbf16>
    %c0_61 = arith.constant 0 : index
    %c0_62 = arith.constant 0 : index
    %c0_63 = arith.constant 0 : index
    %90 = vector.load %arg4[%c0_61, %c0_62, %c0_63] : memref<1x8x32xbf16, #tpu.memory_space<vmem>>, vector<1x8x32xbf16>
    %91 = vector.shape_cast %90 : vector<1x8x32xbf16> to vector<8x32xbf16>
    %92 = vector.shape_cast %89 : vector<8x32xbf16> to vector<1x8x32xbf16>
    tpu.vector_store %arg4[%c0_61, %c0_62, %c0_63], %92 {strides = array<i32>} : memref<1x8x32xbf16, #tpu.memory_space<vmem>>, vector<1x8x32xbf16>,
    return
  }
  func.func @transform_0(%arg0: i32) -> (i32, i32, i32) {
    %c0_i32 = arith.constant 0 : i32
    %c0_i32_0 = arith.constant 0 : i32
    %c0_i32_1 = arith.constant 0 : i32
    return %arg0, %c0_i32, %c0_i32_0 : i32, i32, i32
  }
  func.func @transform_1(%arg0: i32) -> (i32, i32, i32) {
    %c0_i32 = arith.constant 0 : i32
    %c0_i32_0 = arith.constant 0 : i32
    %c0_i32_1 = arith.constant 0 : i32
    return %arg0, %c0_i32, %c0_i32_0 : i32, i32, i32
  }
  func.func @transform_2(%arg0: i32) -> (i32, i32, i32) {
    %c0_i32 = arith.constant 0 : i32
    %c0_i32_0 = arith.constant 0 : i32
    %c0_i32_1 = arith.constant 0 : i32
    return %arg0, %c0_i32, %c0_i32_0 : i32, i32, i32
  }
  func.func @transform_3(%arg0: i32) -> (i32, i32, i32) {
    %c0_i32 = arith.constant 0 : i32
    %c0_i32_0 = arith.constant 0 : i32
    %c0_i32_1 = arith.constant 0 : i32
    return %arg0, %c0_i32, %c0_i32_0 : i32, i32, i32
  }
}

module attributes {stable_mosaic.version = 11 : i64} {
  func.func @_qkv_proj_cross_kernel(%arg0: i32, %arg1: i32, %arg2: memref<16x32xf32, #tpu.memory_space<vmem>>, %arg3: memref<16x32xf32, #tpu.memory_space<vmem>>, %arg4: memref<16x32xf32, #tpu.memory_space<vmem>>, %arg5: memref<32x32xbf16, #tpu.memory_space<vmem>>, %arg6: memref<32x32xbf16, #tpu.memory_space<vmem>>, %arg7: memref<32x32xbf16, #tpu.memory_space<vmem>>, %arg8: memref<1x32xf32, #tpu.memory_space<vmem>>, %arg9: memref<1x32xf32, #tpu.memory_space<vmem>>, %arg10: memref<1x32xf32, #tpu.memory_space<vmem>>, %arg11: memref<16x32xbf16, #tpu.memory_space<vmem>>, %arg12: memref<16x32xbf16, #tpu.memory_space<vmem>>, %arg13: memref<16x32xbf16, #tpu.memory_space<vmem>>, %arg14: memref<16x32xf32, #tpu.memory_space<vmem>>, %arg15: memref<16x32xf32, #tpu.memory_space<vmem>>, %arg16: memref<16x32xf32, #tpu.memory_space<vmem>>) attributes {dimension_semantics = [#tpu.dimension_semantics<parallel>, #tpu.dimension_semantics<arbitrary>], iteration_bounds = array<i64: 1, 1>, scalar_prefetch = 0 : i64, scratch_operands = 3 : i64, tpu.core_type = #tpu.core_type<tc>, window_params = [{transform_indices = @transform_0, window_bounds = array<i64: 16, 32>}, {transform_indices = @transform_1, window_bounds = array<i64: 16, 32>}, {transform_indices = @transform_2, window_bounds = array<i64: 16, 32>}, {transform_indices = @transform_3, window_bounds = array<i64: 32, 32>}, {transform_indices = @transform_4, window_bounds = array<i64: 32, 32>}, {transform_indices = @transform_5, window_bounds = array<i64: 32, 32>}, {pipeline_mode = #tpu.pipeline_mode<synchronous>, transform_indices = @transform_6, window_bounds = array<i64: 1, 32>}, {pipeline_mode = #tpu.pipeline_mode<synchronous>, transform_indices = @transform_7, window_bounds = array<i64: 1, 32>}, {pipeline_mode = #tpu.pipeline_mode<synchronous>, transform_indices = @transform_8, window_bounds = array<i64: 1, 32>}, {transform_indices = @transform_9, window_bounds = array<i64: 16, 32>}, {transform_indices = @transform_10, window_bounds = array<i64: 16, 32>}, {transform_indices = @transform_11, window_bounds = array<i64: 16, 32>}]} {
    %c0_i32 = arith.constant 0 : i32
    %0 = arith.cmpi eq, %arg1, %c0_i32 : i32
    %1 = arith.extui %0 : i1 to i32
    %c0_i32_0 = arith.constant 0 : i32
    %2 = arith.cmpi ne, %1, %c0_i32_0 : i32
    scf.if %2 {
      %cst_28 = arith.constant 0.000000e+00 : f32
      %27 = vector.broadcast %cst_28 : f32 to vector<16x32xf32>
      %c0_29 = arith.constant 0 : index
      %c0_30 = arith.constant 0 : index
      %28 = vector.load %arg14[%c0_29, %c0_30] : memref<16x32xf32, #tpu.memory_space<vmem>>, vector<16x32xf32>
      tpu.vector_store %arg14[%c0_29, %c0_30], %27 {strides = array<i32>} : memref<16x32xf32, #tpu.memory_space<vmem>>, vector<16x32xf32>,
      %cst_31 = arith.constant 0.000000e+00 : f32
      %29 = vector.broadcast %cst_31 : f32 to vector<16x32xf32>
      %c0_32 = arith.constant 0 : index
      %c0_33 = arith.constant 0 : index
      %30 = vector.load %arg15[%c0_32, %c0_33] : memref<16x32xf32, #tpu.memory_space<vmem>>, vector<16x32xf32>
      tpu.vector_store %arg15[%c0_32, %c0_33], %29 {strides = array<i32>} : memref<16x32xf32, #tpu.memory_space<vmem>>, vector<16x32xf32>,
      %cst_34 = arith.constant 0.000000e+00 : f32
      %31 = vector.broadcast %cst_34 : f32 to vector<16x32xf32>
      %c0_35 = arith.constant 0 : index
      %c0_36 = arith.constant 0 : index
      %32 = vector.load %arg16[%c0_35, %c0_36] : memref<16x32xf32, #tpu.memory_space<vmem>>, vector<16x32xf32>
      tpu.vector_store %arg16[%c0_35, %c0_36], %31 {strides = array<i32>} : memref<16x32xf32, #tpu.memory_space<vmem>>, vector<16x32xf32>,
    } else {
    }
    %c0 = arith.constant 0 : index
    %c0_1 = arith.constant 0 : index
    %3 = vector.load %arg2[%c0, %c0_1] : memref<16x32xf32, #tpu.memory_space<vmem>>, vector<16x32xf32>
    %4 = arith.truncf %3 : vector<16x32xf32> to vector<16x32xbf16>
    %c0_2 = arith.constant 0 : index
    %c0_3 = arith.constant 0 : index
    %5 = vector.load %arg3[%c0_2, %c0_3] : memref<16x32xf32, #tpu.memory_space<vmem>>, vector<16x32xf32>
    %6 = arith.truncf %5 : vector<16x32xf32> to vector<16x32xbf16>
    %c0_4 = arith.constant 0 : index
    %c0_5 = arith.constant 0 : index
    %7 = vector.load %arg4[%c0_4, %c0_5] : memref<16x32xf32, #tpu.memory_space<vmem>>, vector<16x32xf32>
    %8 = arith.truncf %7 : vector<16x32xf32> to vector<16x32xbf16>
    %c0_6 = arith.constant 0 : index
    %c0_7 = arith.constant 0 : index
    %9 = vector.load %arg14[%c0_6, %c0_7] : memref<16x32xf32, #tpu.memory_space<vmem>>, vector<16x32xf32>
    %c0_8 = arith.constant 0 : index
    %c0_9 = arith.constant 0 : index
    %10 = vector.load %arg5[%c0_8, %c0_9] : memref<32x32xbf16, #tpu.memory_space<vmem>>, vector<32x32xbf16>
    %cst = arith.constant dense<0.000000e+00> : vector<16x32xf32>
    %11 = tpu.matmul %4, %10, %cst {dimension_numbers = #tpu.dot_dimension_numbers<[1], [0], [0], [1], [0, 0, 1, 1], [], []>} : vector<16x32xbf16>, vector<32x32xbf16>, vector<16x32xf32> -> vector<16x32xf32>
    %12 = arith.addf %9, %11 : vector<16x32xf32>
    %c0_10 = arith.constant 0 : index
    %c0_11 = arith.constant 0 : index
    %13 = vector.load %arg14[%c0_10, %c0_11] : memref<16x32xf32, #tpu.memory_space<vmem>>, vector<16x32xf32>
    tpu.vector_store %arg14[%c0_10, %c0_11], %12 {strides = array<i32>} : memref<16x32xf32, #tpu.memory_space<vmem>>, vector<16x32xf32>,
    %c0_12 = arith.constant 0 : index
    %c0_13 = arith.constant 0 : index
    %14 = vector.load %arg15[%c0_12, %c0_13] : memref<16x32xf32, #tpu.memory_space<vmem>>, vector<16x32xf32>
    %c0_14 = arith.constant 0 : index
    %c0_15 = arith.constant 0 : index
    %15 = vector.load %arg6[%c0_14, %c0_15] : memref<32x32xbf16, #tpu.memory_space<vmem>>, vector<32x32xbf16>
    %cst_16 = arith.constant dense<0.000000e+00> : vector<16x32xf32>
    %16 = tpu.matmul %6, %15, %cst_16 {dimension_numbers = #tpu.dot_dimension_numbers<[1], [0], [0], [1], [0, 0, 1, 1], [], []>} : vector<16x32xbf16>, vector<32x32xbf16>, vector<16x32xf32> -> vector<16x32xf32>
    %17 = arith.addf %14, %16 : vector<16x32xf32>
    %c0_17 = arith.constant 0 : index
    %c0_18 = arith.constant 0 : index
    %18 = vector.load %arg15[%c0_17, %c0_18] : memref<16x32xf32, #tpu.memory_space<vmem>>, vector<16x32xf32>
    tpu.vector_store %arg15[%c0_17, %c0_18], %17 {strides = array<i32>} : memref<16x32xf32, #tpu.memory_space<vmem>>, vector<16x32xf32>,
    %c0_19 = arith.constant 0 : index
    %c0_20 = arith.constant 0 : index
    %19 = vector.load %arg16[%c0_19, %c0_20] : memref<16x32xf32, #tpu.memory_space<vmem>>, vector<16x32xf32>
    %c0_21 = arith.constant 0 : index
    %c0_22 = arith.constant 0 : index
    %20 = vector.load %arg7[%c0_21, %c0_22] : memref<32x32xbf16, #tpu.memory_space<vmem>>, vector<32x32xbf16>
    %cst_23 = arith.constant dense<0.000000e+00> : vector<16x32xf32>
    %21 = tpu.matmul %8, %20, %cst_23 {dimension_numbers = #tpu.dot_dimension_numbers<[1], [0], [0], [1], [0, 0, 1, 1], [], []>} : vector<16x32xbf16>, vector<32x32xbf16>, vector<16x32xf32> -> vector<16x32xf32>
    %22 = arith.addf %19, %21 : vector<16x32xf32>
    %c0_24 = arith.constant 0 : index
    %c0_25 = arith.constant 0 : index
    %23 = vector.load %arg16[%c0_24, %c0_25] : memref<16x32xf32, #tpu.memory_space<vmem>>, vector<16x32xf32>
    tpu.vector_store %arg16[%c0_24, %c0_25], %22 {strides = array<i32>} : memref<16x32xf32, #tpu.memory_space<vmem>>, vector<16x32xf32>,
    %c0_i32_26 = arith.constant 0 : i32
    %24 = arith.cmpi eq, %arg1, %c0_i32_26 : i32
    %25 = arith.extui %24 : i1 to i32
    %c0_i32_27 = arith.constant 0 : i32
    %26 = arith.cmpi ne, %25, %c0_i32_27 : i32
    scf.if %26 {
      %c0_28 = arith.constant 0 : index
      %c0_29 = arith.constant 0 : index
      %27 = vector.load %arg14[%c0_28, %c0_29] : memref<16x32xf32, #tpu.memory_space<vmem>>, vector<16x32xf32>
      %c0_30 = arith.constant 0 : index
      %c0_31 = arith.constant 0 : index
      %28 = vector.load %arg8[%c0_30, %c0_31] : memref<1x32xf32, #tpu.memory_space<vmem>>, vector<1x32xf32>
      %29 = vector.broadcast %28 : vector<1x32xf32> to vector<16x32xf32>
      %30 = arith.addf %27, %29 : vector<16x32xf32>
      %31 = arith.truncf %30 : vector<16x32xf32> to vector<16x32xbf16>
      %c0_32 = arith.constant 0 : index
      %c0_33 = arith.constant 0 : index
      %32 = vector.load %arg11[%c0_32, %c0_33] : memref<16x32xbf16, #tpu.memory_space<vmem>>, vector<16x32xbf16>
      tpu.vector_store %arg11[%c0_32, %c0_33], %31 {strides = array<i32>} : memref<16x32xbf16, #tpu.memory_space<vmem>>, vector<16x32xbf16>,
      %c0_34 = arith.constant 0 : index
      %c0_35 = arith.constant 0 : index
      %33 = vector.load %arg15[%c0_34, %c0_35] : memref<16x32xf32, #tpu.memory_space<vmem>>, vector<16x32xf32>
      %c0_36 = arith.constant 0 : index
      %c0_37 = arith.constant 0 : index
      %34 = vector.load %arg9[%c0_36, %c0_37] : memref<1x32xf32, #tpu.memory_space<vmem>>, vector<1x32xf32>
      %35 = vector.broadcast %34 : vector<1x32xf32> to vector<16x32xf32>
      %36 = arith.addf %33, %35 : vector<16x32xf32>
      %37 = arith.truncf %36 : vector<16x32xf32> to vector<16x32xbf16>
      %c0_38 = arith.constant 0 : index
      %c0_39 = arith.constant 0 : index
      %38 = vector.load %arg12[%c0_38, %c0_39] : memref<16x32xbf16, #tpu.memory_space<vmem>>, vector<16x32xbf16>
      tpu.vector_store %arg12[%c0_38, %c0_39], %37 {strides = array<i32>} : memref<16x32xbf16, #tpu.memory_space<vmem>>, vector<16x32xbf16>,
      %c0_40 = arith.constant 0 : index
      %c0_41 = arith.constant 0 : index
      %39 = vector.load %arg16[%c0_40, %c0_41] : memref<16x32xf32, #tpu.memory_space<vmem>>, vector<16x32xf32>
      %c0_42 = arith.constant 0 : index
      %c0_43 = arith.constant 0 : index
      %40 = vector.load %arg10[%c0_42, %c0_43] : memref<1x32xf32, #tpu.memory_space<vmem>>, vector<1x32xf32>
      %41 = vector.broadcast %40 : vector<1x32xf32> to vector<16x32xf32>
      %42 = arith.addf %39, %41 : vector<16x32xf32>
      %43 = arith.truncf %42 : vector<16x32xf32> to vector<16x32xbf16>
      %c0_44 = arith.constant 0 : index
      %c0_45 = arith.constant 0 : index
      %44 = vector.load %arg13[%c0_44, %c0_45] : memref<16x32xbf16, #tpu.memory_space<vmem>>, vector<16x32xbf16>
      tpu.vector_store %arg13[%c0_44, %c0_45], %43 {strides = array<i32>} : memref<16x32xbf16, #tpu.memory_space<vmem>>, vector<16x32xbf16>,
    } else {
    }
    return
  }
  func.func @transform_0(%arg0: i32, %arg1: i32) -> (i32, i32) {
    %c0_i32 = arith.constant 0 : i32
    return %arg0, %arg1 : i32, i32
  }
  func.func @transform_1(%arg0: i32, %arg1: i32) -> (i32, i32) {
    %c0_i32 = arith.constant 0 : i32
    return %arg0, %arg1 : i32, i32
  }
  func.func @transform_2(%arg0: i32, %arg1: i32) -> (i32, i32) {
    %c0_i32 = arith.constant 0 : i32
    return %arg0, %arg1 : i32, i32
  }
  func.func @transform_3(%arg0: i32, %arg1: i32) -> (i32, i32) {
    %c0_i32 = arith.constant 0 : i32
    %c0_i32_0 = arith.constant 0 : i32
    return %arg1, %c0_i32 : i32, i32
  }
  func.func @transform_4(%arg0: i32, %arg1: i32) -> (i32, i32) {
    %c0_i32 = arith.constant 0 : i32
    %c0_i32_0 = arith.constant 0 : i32
    return %arg1, %c0_i32 : i32, i32
  }
  func.func @transform_5(%arg0: i32, %arg1: i32) -> (i32, i32) {
    %c0_i32 = arith.constant 0 : i32
    %c0_i32_0 = arith.constant 0 : i32
    return %arg1, %c0_i32 : i32, i32
  }
  func.func @transform_6(%arg0: i32, %arg1: i32) -> (i32, i32) {
    %c0_i32 = arith.constant 0 : i32
    %c0_i32_0 = arith.constant 0 : i32
    %c0_i32_1 = arith.constant 0 : i32
    return %c0_i32, %c0_i32_0 : i32, i32
  }
  func.func @transform_7(%arg0: i32, %arg1: i32) -> (i32, i32) {
    %c0_i32 = arith.constant 0 : i32
    %c0_i32_0 = arith.constant 0 : i32
    %c0_i32_1 = arith.constant 0 : i32
    return %c0_i32, %c0_i32_0 : i32, i32
  }
  func.func @transform_8(%arg0: i32, %arg1: i32) -> (i32, i32) {
    %c0_i32 = arith.constant 0 : i32
    %c0_i32_0 = arith.constant 0 : i32
    %c0_i32_1 = arith.constant 0 : i32
    return %c0_i32, %c0_i32_0 : i32, i32
  }
  func.func @transform_9(%arg0: i32, %arg1: i32) -> (i32, i32) {
    %c0_i32 = arith.constant 0 : i32
    %c0_i32_0 = arith.constant 0 : i32
    return %arg0, %c0_i32 : i32, i32
  }
  func.func @transform_10(%arg0: i32, %arg1: i32) -> (i32, i32) {
    %c0_i32 = arith.constant 0 : i32
    %c0_i32_0 = arith.constant 0 : i32
    return %arg0, %c0_i32 : i32, i32
  }
  func.func @transform_11(%arg0: i32, %arg1: i32) -> (i32, i32) {
    %c0_i32 = arith.constant 0 : i32
    %c0_i32_0 = arith.constant 0 : i32
    return %arg0, %c0_i32 : i32, i32
  }
}

</mosaic_0001>

<bundles_post_ra>
// kernel: _mha_forward.5
= control target key start
LH: loop header
LB: loop body
LE: loop exit
PB: predicated region body
PF: predicated region fallthrough
CT: control target
= control target key end

     0   :  { %v175_v1 = vmov 0.0   ;;  %vm176_vm0 = vmmov 0   ;;  %vm20_vm1 = vcmask 261120   ;;  %s222_s0 = inlined_call_operand.vmem [shape: bf16[16,32], index: 0, kind: input, shape index: {}]   ;;  %s223_s1 = inlined_call_operand.vmem [shape: bf16[32,32], index: 1, kind: input, shape index: {}]   ;;  %s224_s2 = inlined_call_operand.vmem [shape: f32[1,32], index: 2, kind: input, shape index: {}]   ;;  %s225_s3 = inlined_call_operand.hbm [shape: f32[16,32], index: 3, kind: output, shape index: {}]  }
   0x1   :  { %v150_v0 = vld [vmem:[%s223_s1 + $0x8] sm:$0xff]   ;;  %137 = vmatprep.subr.bf16.mxu0 %v175_v1  ;;  %v151_v2 = vld [vmem:[%s223_s1] sm:$0xff]   ;;  %141 = vmatprep.mubr.msk.bf16.mxu0 %vm176_vm0, %v175_v1  ;;  %21 = vst.msk [vmem:[#allocation2] sm:$0xff] %vm20_vm1, %v175_v1  ;;  %22 = vst.msk [vmem:[#allocation2 + $0x8] sm:$0xff] %vm20_vm1, %v175_v1 }
   0x2   :  { %138 = vmatpush3.bf16.msra.mxu0 %v150_v0 }
   0x3   :  { %139 = vmatprep.subr.bf16.mxu0 %v175_v1 }
   0x4   :  { %8 = vsyncpa [#allocation4], 0  ;;  %v152_v3 = vld [vmem:[%s222_s0] sm:$0xff]   ;;  %s177_s0 = smov [#allocation3]  }
   0x5   :  { %v133_v12 = vld [vmem:[%s224_s2] ss:$0 sm:$0xff]  ;;  %s118_s19 = sshll.u32 %s177_s0, 4  ;;  %s119_s19 = int_to_ptr.vmem [resolvable:$true] %s118_s19 }
   0x6   :  { %140 = vmatpush3.bf16.msra.mxu0 %v151_v2  ;;  %s153_s20 = scalar_lea.vmem %s119_s19, 256  ;;  %p158_p1 = scmp.lt.s32.totalorder %s119_s19, %s119_s19 }
   0x7   :  { %p154_p0 = scmp.ne.s32.totalorder %s119_s19, %s153_s20  ;;  %p159_p2 = scmp.lt.s32.totalorder %s153_s20, %s153_s20 }
   0x8   :  { %v23_v4 = vld [vmem:[#allocation2] sm:$0xff]  ;;  %v24_v8 = vld [vmem:[#allocation2 + $0x8] sm:$0xff] }
   0x9   :  { %142 = vmatmul.mubr.msk.bf16.vlgmr.msra.gmra.mxu0 %vm20_vm1, %v152_v3  ;;  %p160_p3 = por %p159_p2, %p158_p1 }
   0xb   :  { %p161_p4 = pnand %p160_p3, %p154_p0 }
  0xc9   :  { %v86_v5 = vpop.f32.mrf.mxu0 }
  0xca   :  { %v93_v6 = vadd.f32 %v86_v5, %v23_v4 }
  0xcb   :  { %v143_v7 = vpop.f32.mrf.mxu0 }
  0xcc   :  { %95 = vst.msk [vmem:[#allocation2] sm:$0xff] %vm20_vm1, %v93_v6 }
  0xcd   :  { %v89_v9 = vpop.f32.mrf.mxu0 }
  0xce   :  { %v94_v10 = vadd.f32 %v89_v9, %v24_v8 }
  0xcf   :  { %v144_v11 = vpop.f32.mrf.mxu0 }
  0xd0   :  { %96 = vst.msk [vmem:[#allocation2 + $0x8] sm:$0xff] %vm20_vm1, %v94_v10 }
  0xd3   :  { %v100_v13 = vld [vmem:[#allocation2] sm:$0xff] }
  0xd4   :  { %v109_v14 = vadd.f32 %v133_v12, %v100_v13 }
  0xd6   :  { %111 = vst.msk [vmem:[#allocation3] sm:$0xff] %vm20_vm1, %v109_v14 }
  0xd7   :  { %v101_v15 = vld [vmem:[#allocation2 + $0x8] sm:$0xff] }
  0xd8   :  { %v110_v16 = vadd.f32 %v133_v12, %v101_v15 }
  0xda   :  { %112 = vst.msk [vmem:[#allocation3 + $0x8] sm:$0xff] %vm20_vm1, %v110_v16 }
  0xdb   :  { %164 = shalt.err (!%p161_p4)
}
  0xdc   :  { %s178_s21 = smov 128   ;;  %s179_s2 = smov 8  }
  0xdd   :  { %124 = dma.vmem_to_hbm [thread:$0]  %s119_s19, 256, %s225_s3, [#allocation4], %s178_s21, %s178_s21, %s179_s2  }
  0xde   :  { %173 = dma.done.wait [#allocation4], 256  }
  0xdf   :  { %174 = vsyncadd [#allocation4], 4294967040 }
  0xe0   :  { %128 = vsyncpa [#allocation4], 1 }

// kernel: _mha_forward.3
= control target key start
LH: loop header
LB: loop body
LE: loop exit
PB: predicated region body
PF: predicated region fallthrough
CT: control target
= control target key end

     0   :  { %17 = vsyncpa [#allocation6], 0  ;;  %s737_s0 = inlined_call_operand.vmem [shape: f32[16,32], index: 0, kind: input, shape index: {}]   ;;  %s738_s1 = inlined_call_operand.hbm [shape: f32[16,32], index: 1, kind: input, shape index: {}]   ;;  %s739_s2 = inlined_call_operand.hbm [shape: f32[16,32], index: 2, kind: input, shape index: {}]   ;;  %s740_s3 = inlined_call_operand.hbm [shape: bf16[32,32], index: 3, kind: input, shape index: {}]   ;;  %s741_s4 = inlined_call_operand.hbm [shape: bf16[32,32], index: 4, kind: input, shape index: {}]   ;;  %s742_s5 = inlined_call_operand.hbm [shape: bf16[32,32], index: 5, kind: input, shape index: {}]   ;;  %s743_s6 = inlined_call_operand.vmem [shape: f32[1,32], index: 6, kind: input, shape index: {}]   ;;  %s744_s7 = inlined_call_operand.vmem [shape: f32[1,32], index: 7, kind: input, shape index: {}]   ;;  %s745_s8 = inlined_call_operand.vmem [shape: f32[1,32], index: 8, kind: input, shape index: {}]   ;;  %s746_s9 = inlined_call_operand.vmem [shape: bf16[16,32], index: 9, kind: output, shape index: {0}]   ;;  %s747_s10 = inlined_call_operand.vmem [shape: bf16[16,32], index: 10, kind: output, shape index: {1}]   ;;  %s748_s11 = inlined_call_operand.vmem [shape: bf16[16,32], index: 11, kind: output, shape index: {2}]  }
   0x1   :  { %18 = vsyncpa [#allocation8], 0 }
   0x2   :  { %19 = vsyncpa [#allocation11], 0  ;;  %s585_s17 = smov [#allocation7]  }
   0x3   :  { %s39_s18 = sshll.u32 %s585_s17, 4  ;;  %s40_s18 = int_to_ptr.vmem [resolvable:$true] %s39_s18 }
   0x4   :  { %s487_s19 = scalar_lea.vmem %s40_s18, 256  ;;  %p492_p1 = scmp.lt.s32.totalorder %s40_s18, %s40_s18 }
   0x5   :  { %p488_p0 = scmp.ne.s32.totalorder %s40_s18, %s487_s19  ;;  %p493_p2 = scmp.lt.s32.totalorder %s487_s19, %s487_s19 }
   0x7   :  { %p494_p3 = por %p493_p2, %p492_p1 }
   0x9   :  { %p495_p4 = pnand %p494_p3, %p488_p0 }
   0xb   :  { %498 = shalt.err (!%p495_p4)
}
   0xc   :  { %s586_s20 = smov 128   ;;  %s587_s21 = smov 8  }
   0xd   :  { %45 = dma.hbm_to_vmem [thread:$0]  %s739_s2, 256, %s40_s18, [#allocation8], %s586_s20, %s586_s20, %s587_s21  }
   0xe   :  { %s588_s24 = smov [#allocation10]   ;;  %s589_s26 = smov [#allocation5]  }
   0xf   :  { %s63_s25 = sshll.u32 %s588_s24, 4  ;;  %s27_s27 = sshll.u32 %s589_s26, 4  ;;  %s64_s25 = int_to_ptr.vmem [resolvable:$true] %s63_s25  ;;  %s28_s27 = int_to_ptr.vmem [resolvable:$true] %s27_s27 }
  0x10   :  { %s507_s28 = scalar_lea.vmem %s64_s25, 256  ;;  %p512_p6 = scmp.lt.s32.totalorder %s64_s25, %s64_s25 }
  0x11   :  { %p508_p5 = scmp.ne.s32.totalorder %s64_s25, %s507_s28  ;;  %p513_p7 = scmp.lt.s32.totalorder %s507_s28, %s507_s28 }
  0x13   :  { %p514_p8 = por %p513_p7, %p512_p6 }
  0x15   :  { %p515_p9 = pnand %p514_p8, %p508_p5 }
  0x17   :  { %518 = shalt.err (!%p515_p9)
}
  0x18   :  { %s590_s29 = smov 64   ;;  %s591_s30 = smov 4  }
  0x19   :  { %69 = dma.hbm_to_vmem [thread:$0]  %s741_s4, 256, %s64_s25, [#allocation11], %s590_s29, %s590_s29, %s591_s30  }
  0x1a   :  { %s527_s2 = scalar_lea.vmem %s28_s27, 256  ;;  %p532_p11 = scmp.lt.s32.totalorder %s28_s27, %s28_s27 }
  0x1b   :  { %p528_p10 = scmp.ne.s32.totalorder %s28_s27, %s527_s2  ;;  %p533_p12 = scmp.lt.s32.totalorder %s527_s2, %s527_s2 }
  0x1d   :  { %p534_p13 = por %p533_p12, %p532_p11 }
  0x1f   :  { %p535_p0 = pnand %p534_p13, %p528_p10 }
  0x21   :  { %538 = shalt.err (!%p535_p0)
}
  0x22   :  { %33 = dma.hbm_to_vmem [thread:$0]  %s738_s1, 256, %s28_s27, [#allocation6], %s586_s20, %s586_s20, %s587_s21  }
  0x23   :  { %s592_s16 = smov [#allocation9]   ;;  %s593_s18 = smov [#allocation12]  }
  0x24   :  { %s51_s17 = sshll.u32 %s592_s16, 4  ;;  %s75_s19 = sshll.u32 %s593_s18, 4  ;;  %s52_s17 = int_to_ptr.vmem [resolvable:$true] %s51_s17  ;;  %s76_s19 = int_to_ptr.vmem [resolvable:$true] %s75_s19 }
  0x25   :  { %s547_s22 = scalar_lea.vmem %s52_s17, 256  ;;  %p552_p2 = scmp.lt.s32.totalorder %s52_s17, %s52_s17 }
  0x26   :  { %p548_p1 = scmp.ne.s32.totalorder %s52_s17, %s547_s22  ;;  %p553_p3 = scmp.lt.s32.totalorder %s547_s22, %s547_s22 }
  0x28   :  { %p554_p4 = por %p553_p3, %p552_p2 }
  0x2a   :  { %p555_p5 = pnand %p554_p4, %p548_p1 }
  0x2c   :  { %558 = shalt.err (!%p555_p5)
}
  0x2d   :  { %57 = dma.hbm_to_vmem [thread:$0]  %s740_s3, 256, %s52_s17, [#allocation8], %s590_s29, %s590_s29, %s591_s30  }
  0x2e   :  { %s567_s1 = scalar_lea.vmem %s76_s19, 256  ;;  %p572_p7 = scmp.lt.s32.totalorder %s76_s19, %s76_s19 }
  0x2f   :  { %p568_p6 = scmp.ne.s32.totalorder %s76_s19, %s567_s1  ;;  %p573_p8 = scmp.lt.s32.totalorder %s567_s1, %s567_s1 }
  0x31   :  { %p574_p9 = por %p573_p8, %p572_p7 }
  0x33   :  { %p575_p10 = pnand %p574_p9, %p568_p6 }
  0x35   :  { %578 = shalt.err (!%p575_p10)
}
  0x36   :  { %81 = dma.hbm_to_vmem [thread:$0]  %s742_s5, 256, %s76_s19, [#allocation11], %s590_s29, %s590_s29, %s591_s30  }
  0x37   :  { %579 = dma.done.wait [#allocation6], 256  }
  0x38   :  { %580 = vsyncadd [#allocation6], 4294967040 }
  0x39   :  { %581 = dma.done.wait [#allocation8], 512  }
  0x3a   :  { %582 = vsyncadd [#allocation8], 4294966784 }
  0x3b   :  { %583 = dma.done.wait [#allocation11], 512  }
  0x3c   :  { %584 = vsyncadd [#allocation11], 4294966784  ;;  %vm108_vm0 = vcmask 261120   ;;  %v594_v0 = vmov 0.0   ;;  %vm595_vm1 = vmmov 0   ;;  %v473_v1 = vld [vmem:[#allocation9 + $0x8] sm:$0xff]  }
  0x3d   :  { %438 = vmatprep.subr.bf16.mxu0 %v594_v0  ;;  %446 = vmatprep.subr.bf16.mxu1 %v594_v0  ;;  %109 = vst.msk [vmem:[#allocation2] sm:$0xff] %vm108_vm0, %v594_v0  ;;  %110 = vst.msk [vmem:[#allocation2 + $0x8] sm:$0xff] %vm108_vm0, %v594_v0  ;;  %v474_v2 = vld [vmem:[#allocation10 + $0x8] sm:$0xff]   ;;  %v475_v3 = vld [vmem:[#allocation9] sm:$0xff]   ;;  %vm345_vm2 = vcmask 257024  }
  0x3e   :  { %111 = vst.msk [vmem:[#allocation3] sm:$0xff] %vm108_vm0, %v594_v0  ;;  %112 = vst.msk [vmem:[#allocation3 + $0x8] sm:$0xff] %vm108_vm0, %v594_v0  ;;  %442 = vmatprep.mubr.msk.bf16.mxu0 %vm595_vm1, %v594_v0  ;;  %450 = vmatprep.mubr.msk.bf16.mxu1 %vm595_vm1, %v594_v0  ;;  %v115_v4 = vld [vmem:[%s737_s0] sm:$0xff]  ;;  %v116_v5 = vld [vmem:[%s737_s0 + $0x8] sm:$0xff] }
  0x3f   :  { %113 = vst.msk [vmem:[#allocation4] sm:$0xff] %vm108_vm0, %v594_v0  ;;  %114 = vst.msk [vmem:[#allocation4 + $0x8] sm:$0xff] %vm108_vm0, %v594_v0  ;;  %439 = vmatpush3.bf16.msra.mxu0 %v473_v1  ;;  %447 = vmatpush3.bf16.msra.mxu1 %v474_v2  ;;  %v476_v6 = vld [vmem:[#allocation10] sm:$0xff]   ;;  %v117_v7 = vpack.c.bf16 %v116_v5, %v115_v4  ;;  %v477_v8 = vld [vmem:[#allocation12 + $0x8] sm:$0xff]  }
  0x40   :  { %440 = vmatprep.subr.bf16.mxu0 %v594_v0  ;;  %448 = vmatprep.subr.bf16.mxu1 %v594_v0  ;;  %v118_v9 = vld [vmem:[#allocation5] sm:$0xff]  ;;  %v119_v10 = vld [vmem:[#allocation5 + $0x8] sm:$0xff]  ;;  %v121_v13 = vld [vmem:[#allocation7] sm:$0xff] }
  0x41   :  { %v120_v11 = vpack.c.bf16 %v119_v10, %v118_v9  ;;  %v478_v12 = vld [vmem:[#allocation12] sm:$0xff]   ;;  %v122_v14 = vld [vmem:[#allocation7 + $0x8] sm:$0xff]  ;;  %v414_v33 = vld [vmem:[%s743_s6] ss:$0 sm:$0xff] }
  0x42   :  { %v123_v15 = vpack.c.bf16 %v122_v14, %v121_v13  ;;  %v417_v35 = vld [vmem:[%s744_s7] ss:$0 sm:$0xff] }
  0x43   :  { %441 = vmatpush3.bf16.msra.mxu0 %v475_v3  ;;  %449 = vmatpush3.bf16.msra.mxu1 %v476_v6  ;;  %v420_v52 = vld [vmem:[%s745_s8] ss:$0 sm:$0xff] }
  0x44   :  { %454 = vmatprep.subr.bf16.mxu0 %v594_v0  ;;  %v124_v16 = vld [vmem:[#allocation2] sm:$0xff]  ;;  %v125_v23 = vld [vmem:[#allocation2 + $0x8] sm:$0xff] }
  0x45   :  { %v191_v17 = vld [vmem:[#allocation3] sm:$0xff]  ;;  %v192_v25 = vld [vmem:[#allocation3 + $0x8] sm:$0xff] }
  0x46   :  { %443 = vmatmul.mubr.msk.bf16.vlgmr.msra.gmra.mxu0 %vm108_vm0, %v117_v7  ;;  %451 = vmatmul.mubr.msk.bf16.vlgmr.msra.gmra.mxu1 %vm108_vm0, %v120_v11  ;;  %v257_v31 = vld [vmem:[#allocation4] sm:$0xff]  ;;  %v258_v39 = vld [vmem:[#allocation4 + $0x8] sm:$0xff] }
  0x47   :  { %455 = vmatpush3.bf16.msra.mxu0 %v477_v8  ;;  %458 = vmatprep.mubr.msk.bf16.mxu0 %vm595_vm1, %v594_v0 }
  0x48   :  { %456 = vmatprep.subr.bf16.mxu0 %v594_v0 }
  0x4b   :  { %457 = vmatpush3.bf16.msra.mxu0 %v478_v12 }
  0x4e   :  { %459 = vmatmul.mubr.msk.bf16.vlgmr.msra.gmra.mxu0 %vm108_vm0, %v123_v15 }
 0x106   :  { %v180_v18 = vpop.f32.mrf.mxu0  ;;  %v246_v20 = vpop.f32.mrf.mxu1 }
 0x107   :  { %v187_v19 = vadd.f32 %v180_v18, %v124_v16  ;;  %v253_v22 = vadd.f32 %v246_v20, %v191_v17 }
 0x108   :  { %v444_v21 = vpop.f32.mrf.mxu0  ;;  %v452_v24 = vpop.f32.mrf.mxu1 }
 0x109   :  { %189 = vst.msk [vmem:[#allocation2] sm:$0xff] %vm108_vm0, %v187_v19  ;;  %255 = vst.msk [vmem:[#allocation3] sm:$0xff] %vm108_vm0, %v253_v22 }
 0x10a   :  { %v183_v26 = vpop.f32.mrf.mxu0  ;;  %v249_v28 = vpop.f32.mrf.mxu1 }
 0x10b   :  { %v188_v27 = vadd.f32 %v183_v26, %v125_v23  ;;  %v254_v30 = vadd.f32 %v249_v28, %v192_v25 }
 0x10c   :  { %v445_v29 = vpop.f32.mrf.mxu0  ;;  %v453_v32 = vpop.f32.mrf.mxu1 }
 0x10d   :  { %190 = vst.msk [vmem:[#allocation2 + $0x8] sm:$0xff] %vm108_vm0, %v188_v27  ;;  %256 = vst.msk [vmem:[#allocation3 + $0x8] sm:$0xff] %vm108_vm0, %v254_v30 }
 0x10e   :  { %v312_v34 = vpop.f32.mrf.mxu0 }
 0x10f   :  { %v319_v36 = vadd.f32 %v312_v34, %v257_v31 }
 0x110   :  { %v326_v37 = vld [vmem:[#allocation2] sm:$0xff]  ;;  %v460_v38 = vpop.f32.mrf.mxu0  ;;  %v348_v41 = vld [vmem:[#allocation3] sm:$0xff] }
 0x111   :  { %v335_v40 = vadd.f32 %v414_v33, %v326_v37  ;;  %321 = vst.msk [vmem:[#allocation4] sm:$0xff] %vm108_vm0, %v319_v36  ;;  %v357_v42 = vadd.f32 %v417_v35, %v348_v41 }
 0x112   :  { %v315_v43 = vpop.f32.mrf.mxu0 }
 0x113   :  { %v423_v44 = vpack.c.bf16 %v335_v40, %v335_v40  ;;  %v320_v45 = vadd.f32 %v315_v43, %v258_v39  ;;  %v425_v46 = vpack.c.bf16 %v357_v42, %v357_v42 }
 0x114   :  { %v327_v47 = vld [vmem:[#allocation2 + $0x8] sm:$0xff]  ;;  %v461_v48 = vpop.f32.mrf.mxu0  ;;  %v349_v50 = vld [vmem:[#allocation3 + $0x8] sm:$0xff] }
 0x115   :  { %346 = vst.msk [vmem:[%s746_s9] sm:$0xf] %vm345_vm2, %v423_v44  ;;  %v336_v49 = vadd.f32 %v414_v33, %v327_v47  ;;  %367 = vst.msk [vmem:[%s747_s10] sm:$0xf] %vm345_vm2, %v425_v46  ;;  %v358_v51 = vadd.f32 %v417_v35, %v349_v50 }
 0x116   :  { %322 = vst.msk [vmem:[#allocation4 + $0x8] sm:$0xff] %vm108_vm0, %v320_v45 }
 0x117   :  { %v424_v53 = vpack.c.bf16 %v336_v49, %v336_v49  ;;  %v426_v54 = vpack.c.bf16 %v358_v51, %v358_v51 }
 0x118   :  { %v369_v55 = vld [vmem:[#allocation4] sm:$0xff] }
 0x119   :  { %347 = vst.msk [vmem:[%s746_s9 + $0x4] sm:$0xf] %vm345_vm2, %v424_v53  ;;  %v378_v56 = vadd.f32 %v420_v52, %v369_v55  ;;  %368 = vst.msk [vmem:[%s747_s10 + $0x4] sm:$0xf] %vm345_vm2, %v426_v54 }
 0x11b   :  { %v427_v57 = vpack.c.bf16 %v378_v56, %v378_v56 }
 0x11d   :  { %v370_v58 = vld [vmem:[#allocation4 + $0x8] sm:$0xff]  ;;  %388 = vst.msk [vmem:[%s748_s11] sm:$0xf] %vm345_vm2, %v427_v57 }
 0x11e   :  { %v379_v59 = vadd.f32 %v420_v52, %v370_v58 }
 0x120   :  { %v428_v60 = vpack.c.bf16 %v379_v59, %v379_v59 }
 0x122   :  { %389 = vst.msk [vmem:[%s748_s11 + $0x4] sm:$0xf] %vm345_vm2, %v428_v60 }
 0x123   :  { %402 = vsyncpa [#allocation6], 1 }
 0x124   :  { %403 = vsyncpa [#allocation8], 1 }
 0x125   :  { %404 = vsyncpa [#allocation11], 1 }

// kernel: _mha_forward.4
= control target key start
LH: loop header
LB: loop body
LE: loop exit
PB: predicated region body
PF: predicated region fallthrough
CT: control target
= control target key end

     0   :  { %s953_s12 = smov 0   ;;  %s1052_s0 = inlined_call_operand.vmem [shape: bf16[2,8,32], index: 0, kind: input, shape index: {}]   ;;  %s1053_s1 = inlined_call_operand.vmem [shape: bf16[2,8,32], index: 1, kind: input, shape index: {}]   ;;  %s1054_s2 = inlined_call_operand.vmem [shape: bf16[2,8,32], index: 2, kind: input, shape index: {}]   ;;  %s1055_s3 = inlined_call_operand.vmem [shape: bf16[2,8,32], index: 3, kind: output, shape index: {}]  }
   0x1 LB: > { %s780_s13 = sadd.s32 4294967295, %s923_s12   ;;  %p784_p0 = scmp.ge.s32.totalorder %s923_s12, 1  ;;  %s923_s12 = sphi %s953_s12, %s13_s12  }
   0x2   : > { %p154_p1 = scmp.lt.s32.totalorder %s923_s12, 3 }
   0x4   : > { %p155_p2 = pnand %p784_p0, %p154_p1 }
   0x5   : > { %p184_p3 = scmp.lt.s32.totalorder (!%p155_p2), %s780_s13, 1  ;;  %s927_s21 = smov (!%p155_p2), 120  }
   0x6   : > { %158 = sbr.rel (%p155_p2) target bundleno = 1417 (0x589), region = 32  ;;  %s928_s22 = smov (!%p155_p2), 112  }
   0x7   : > { %s929_s23 = smov (!%p155_p2), 104   ;;  %s930_s27 = smov (!%p155_p2), 8  }
   0x8   : > { %s931_s28 = smov (!%p155_p2), 16   ;;  %s932_s29 = smov (!%p155_p2), 24  }
   0xb   : > { %v925_v0 = vmov 0.0   ;;  %vm926_vm0 = vmmov 0   ;;  %s1057_s13 = smov (!%p184_p3, %s780_s13), 1  ;;  %vm204_vm1 = vcmask 64512   ;;  %vm267_vm2 = vcmask 1043456  }
   0xc   : > { %828 = vmatprep.subr.bf16.mxu0 %v925_v0  ;;  %830 = vmatprep.mubr.msk.bf16.mxu0 %vm926_vm0, %v925_v0  ;;  %s967_s14 = sshll.u32 %s1057_s13, 2  ;;  %vm439_vm3 = vcmask 130112   ;;  %vm568_vm4 = vcmask 195712   ;;  %vm697_vm5 = vcmask 261312   ;;  %vm701_vm6 = vcmask 257024  }
   0xd   : > { %834 = vmatprep.subr.bf16.mxu1 %v925_v0  ;;  %836 = vmatprep.mubr.msk.bf16.mxu1 %vm926_vm0, %v925_v0  ;;  %s973_s17 = scalar_lea.vmem %s1053_s1, %s967_s14  ;;  %s187_s20 = scalar_lea.vmem %s1052_s0, %s967_s14 }
   0xe   : > { %v202_v1 = vld [vmem:[%s973_s17] sm:$0xf]  ;;  %s998_s26 = scalar_lea.vmem %s1054_s2, %s967_s14  ;;  %s199_s5 = scalar_lea.vmem %s1055_s3, %s967_s14 }
   0xf   : > { %v209_v2 = vsel %vm204_vm1, %v202_v1, 0  ;;  %v201_v3 = vld [vmem:[%s187_s20] sm:$0xf] }
  0x10   : > { %829 = vmatpush3.bf16.xpose.msra.mxu0 %v209_v2  ;;  %v892_v9 = vld [vmem:[%s973_s17] ss:$0 sps:$4 sm:$0xff]  }
  0x11   : > { %846 = vmatprep.subr.bf16.mxu0 %v925_v0  ;;  %323 = vrot.lane.b32.xlu1 %v892_v9, %s927_s21  ;;  %v893_v10 = vld [vmem:[%s187_s20] ss:$0 sps:$4 sm:$0xff]  }
  0x12   : > { %v895_v11 = vld [vmem:[%s187_s20] ss:$0 sps:$4 sm:$0xff]  }
  0x13   : > { %v896_v12 = vld [vmem:[%s973_s17] ss:$0 sps:$4 sm:$0xff]  }
  0x14   : > { %v897_v13 = vld [vmem:[%s187_s20] ss:$0 sps:$4 sm:$0xff]  }
  0x15   : > { %318 = vrot.lane.b32.xlu1 %v893_v10, %s927_s21  ;;  %v203_v19 = vld [vmem:[%s998_s26] sm:$0xf] }
  0x16   : > { %v269_v20 = vsel %vm267_vm2, %v203_v19, 0  ;;  %v894_v21 = vld [vmem:[%s973_s17] ss:$0 sps:$4 sm:$0xff]  }
  0x17   : > { %831 = vmatmul.mubr.msk.bf16.vlgmr.msra.gmra.mxu0 %vm204_vm1, %v201_v3  ;;  %835 = vmatpush3.bf16.msra.mxu1 %v269_v20  ;;  %v898_v2 = vld [vmem:[%s998_s26] ss:$0 sps:$4 sm:$0xff]  }
  0x18   : > { %848 = vmatprep.mubr.msk.bf16.mxu0 %vm926_vm0, %v925_v0  ;;  %840 = vmatprep.subr.bf16.mxu1 %v925_v0  ;;  %v900_v9 = vld [vmem:[%s998_s26] ss:$0 sps:$4 sm:$0xff]  }
  0x19   : > { %447 = vrot.lane.b32.xlu1 %v895_v11, %s928_s22 }
  0x1d   : > { %581 = vrot.lane.b32.xlu1 %v896_v12, %s929_s23 }
  0x21   : > { %576 = vrot.lane.b32.xlu1 %v897_v13, %s929_s23 }
  0x83   : > { %v324_v25 = vpop.permute.xlu1 %323 }
  0x84   : > { %v329_v27 = vsel %vm204_vm1, %v324_v25, 0 }
  0x87   : > { %v319_v29 = vpop.permute.xlu1 %318 }
  0x8b   : > { %v448_v31 = vpop.permute.xlu1 %447 }
  0x8f   : > { %v582_v33 = vpop.permute.xlu1 %581 }
  0x90   : > { %v587_v34 = vsel %vm204_vm1, %v582_v33, 0 }
  0x93   : > { %v577_v35 = vpop.permute.xlu1 %576 }
  0xd7   : > { %v245_v4 = vpop.f32.mrf.mxu0 }
  0xd8   : > { %v251_v5 = vsel %vm204_vm1, %v245_v4, -inf }
  0xd9   : > { %252 = vmax.xlane.f32.xlu0 %v251_v5  ;;  %v832_v6 = vpop.f32.mrf.mxu0 }
  0xdb   : > { %v248_v7 = vpop.f32.mrf.mxu0 }
  0xdd   : > { %v833_v8 = vpop.f32.mrf.mxu0 }
 0x162   : > { %v253_v14 = vpop.xlane.xlu0 %252 }
 0x163   : > { %v254_v15 = vsub.f32 %v245_v4, %v253_v14  ;;  %v899_v4 = vld [vmem:[%s998_s26] ss:$0 sps:$4 sm:$0xff]  }
 0x165   : > { %v255_v16 = vmul.f32 1.442695, %v254_v15 }
 0x167   : > { %901 = vpow2.f32 %v255_v16 }
 0x174   : > { %v902_v17 = vpop.eup %901 }
 0x175   : > { %v257_v18 = vsel %vm204_vm1, %v902_v17, 0.0  ;;  %v790_v23 = vadd.f32 -1.0, %v902_v17 }
 0x176   : > { %258 = vadd.xlane.f32.xlu0 %v257_v18 }
 0x18c   : > { %452 = vrot.lane.b32.xlu0 %v894_v21, %s928_s22 }
 0x1ff   : > { %v259_v22 = vpop.xlane.xlu0 %258 }
 0x200   : > { %903 = vrcp.f32 %v259_v22 }
 0x203   : > { %v453_v30 = vpop.permute.xlu0 %452 }
 0x204   : > { %v458_v32 = vsel %vm204_vm1, %v453_v30, 0 }
 0x20d   : > { %v904_v24 = vpop.eup %903 }
 0x20e   : > { %v262_v26 = vmul.f32 %v904_v24, %v790_v23 }
 0x210   : > { %v263_v28 = vpack.c.bf16 %v262_v26, %v262_v26 }
 0x212   : > { %837 = vmatmul.mubr.msk.bf16.vlgmr.msra.gmra.mxu1 %vm204_vm1, %v263_v28 }
 0x213   : > { %841 = vmatpush3.bf16.xpose.msra.mxu1 %v329_v27  ;;  %842 = vmatprep.mubr.msk.bf16.mxu1 %vm926_vm0, %v925_v0 }
 0x214   : > { %852 = vmatprep.subr.bf16.mxu1 %v925_v0 }
 0x21a   : > { %843 = vmatmul.mubr.msk.bf16.vlgmr.msra.gmra.mxu1 %vm204_vm1, %v319_v29 }
 0x21b   : > { %853 = vmatpush3.bf16.xpose.msra.mxu1 %v458_v32  ;;  %854 = vmatprep.mubr.msk.bf16.mxu1 %vm926_vm0, %v925_v0 }
 0x21c   : > { %864 = vmatprep.subr.bf16.mxu1 %v925_v0 }
 0x222   : > { %855 = vmatmul.mubr.msk.bf16.vlgmr.msra.gmra.mxu1 %vm204_vm1, %v448_v31 }
 0x223   : > { %865 = vmatpush3.bf16.xpose.msra.mxu1 %v587_v34  ;;  %866 = vmatprep.mubr.msk.bf16.mxu1 %vm926_vm0, %v925_v0 }
 0x22a   : > { %867 = vmatmul.mubr.msk.bf16.vlgmr.msra.gmra.mxu1 %vm204_vm1, %v577_v35 }
 0x2d2   : > { %v305_v36 = vpop.f32.mrf.mxu1 }
 0x2d3   : > { %311 = vst.msk [vmem:[#allocation2] sm:$0xff] %vm204_vm1, %v305_v36 }
 0x2d4   : > { %v838_v37 = vpop.f32.mrf.mxu1 }
 0x2d6   : > { %v308_v38 = vpop.f32.mrf.mxu1 }
 0x2d8   : > { %v839_v39 = vpop.f32.mrf.mxu1 }
 0x2da   : > { %v365_v40 = vpop.f32.mrf.mxu1 }
 0x2db   : > { %v371_v41 = vsel %vm204_vm1, %v365_v40, -inf }
 0x2dc   : > { %372 = vmax.xlane.f32.xlu1 %v371_v41  ;;  %v844_v42 = vpop.f32.mrf.mxu1 }
 0x2de   : > { %v368_v43 = vpop.f32.mrf.mxu1 }
 0x2e0   : > { %v845_v44 = vpop.f32.mrf.mxu1 }
 0x2e2   : > { %v494_v45 = vpop.f32.mrf.mxu1 }
 0x2e3   : > { %v500_v46 = vsel %vm204_vm1, %v494_v45, -inf }
 0x2e4   : > { %501 = vmax.xlane.f32.xlu0 %v500_v46  ;;  %v856_v47 = vpop.f32.mrf.mxu1 }
 0x2e6   : > { %v497_v48 = vpop.f32.mrf.mxu1 }
 0x2e8   : > { %v857_v49 = vpop.f32.mrf.mxu1 }
 0x2ea   : > { %v623_v50 = vpop.f32.mrf.mxu1 }
 0x2eb   : > { %v629_v51 = vsel %vm204_vm1, %v623_v50, -inf }
 0x2ec   : > { %630 = vmax.xlane.f32.xlu1 %v629_v51  ;;  %v868_v52 = vpop.f32.mrf.mxu1 }
 0x2ee   : > { %v626_v53 = vpop.f32.mrf.mxu1 }
 0x2f0   : > { %v869_v54 = vpop.f32.mrf.mxu1 }
 0x365   : > { %v373_v55 = vpop.xlane.xlu1 %372 }
 0x366   : > { %v374_v56 = vsub.f32 %v365_v40, %v373_v55 }
 0x368   : > { %v375_v57 = vmul.f32 1.442695, %v374_v56 }
 0x36a   : > { %905 = vpow2.f32 %v375_v57 }
 0x36d   : > { %v502_v58 = vpop.xlane.xlu0 %501 }
 0x36e   : > { %v503_v59 = vsub.f32 %v494_v45, %v502_v58 }
 0x370   : > { %v504_v60 = vmul.f32 1.442695, %v503_v59 }
 0x372   : > { %907 = vpow2.f32 %v504_v60 }
 0x375   : > { %v631_v3 = vpop.xlane.xlu1 %630 }
 0x376   : > { %v632_v5 = vsub.f32 %v623_v50, %v631_v3 }
 0x377   : > { %v906_v61 = vpop.eup %905 }
 0x378   : > { %v377_v62 = vsel %vm204_vm1, %v906_v61, 0.0  ;;  %v633_v6 = vmul.f32 1.442695, %v632_v5  ;;  %v795_v14 = vadd.f32 -1.0, %v906_v61 }
 0x379   : > { %378 = vadd.xlane.f32.xlu1 %v377_v62 }
 0x37a   : > { %909 = vpow2.f32 %v633_v6 }
 0x37f   : > { %v908_v63 = vpop.eup %907 }
 0x380   : > { %v506_v1 = vsel %vm204_vm1, %v908_v63, 0.0  ;;  %v801_v20 = vadd.f32 -1.0, %v908_v63 }
 0x381   : > { %507 = vadd.xlane.f32.xlu0 %v506_v1 }
 0x387   : > { %v910_v7 = vpop.eup %909 }
 0x388   : > { %v635_v8 = vsel %vm204_vm1, %v910_v7, 0.0  ;;  %v807_v27 = vadd.f32 -1.0, %v910_v7 }
 0x38a   : > { %516 = vrot.lane.b32.xlu1 %v898_v2, %s928_s22 }
 0x397   : > { %387 = vrot.lane.b32.xlu0 %v899_v4, %s927_s21 }
 0x3ae   : > { %636 = vadd.xlane.f32.xlu1 %v635_v8 }
 0x3bf   : > { %645 = vrot.lane.b32.xlu1 %v900_v9, %s929_s23 }
 0x402   : > { %v379_v10 = vpop.xlane.xlu1 %378 }
 0x403   : > { %911 = vrcp.f32 %v379_v10 }
 0x406   : > { %v517_v17 = vpop.permute.xlu1 %516 }
 0x407   : > { %v522_v19 = vsel %vm267_vm2, %v517_v17, 0 }
 0x40a   : > { %v508_v11 = vpop.xlane.xlu0 %507 }
 0x40b   : > { %913 = vrcp.f32 %v508_v11 }
 0x40e   : > { %v388_v12 = vpop.permute.xlu0 %387 }
 0x40f   : > { %v393_v13 = vsel %vm267_vm2, %v388_v12, 0 }
 0x410   : > { %v912_v15 = vpop.eup %911  ;;  %847 = vmatpush3.bf16.msra.mxu0 %v393_v13 }
 0x411   : > { %858 = vmatprep.subr.bf16.mxu0 %v925_v0  ;;  %v382_v16 = vmul.f32 %v912_v15, %v795_v14 }
 0x413   : > { %v383_v18 = vpack.c.bf16 %v382_v16, %v382_v16 }
 0x415   : > { %849 = vmatmul.mubr.msk.bf16.vlgmr.msra.gmra.mxu0 %vm204_vm1, %v383_v18 }
 0x416   : > { %859 = vmatpush3.bf16.msra.mxu0 %v522_v19  ;;  %860 = vmatprep.mubr.msk.bf16.mxu0 %vm926_vm0, %v925_v0 }
 0x417   : > { %870 = vmatprep.subr.bf16.mxu0 %v925_v0 }
 0x418   : > { %v914_v21 = vpop.eup %913 }
 0x419   : > { %v511_v22 = vmul.f32 %v914_v21, %v801_v20 }
 0x41b   : > { %v512_v23 = vpack.c.bf16 %v511_v22, %v511_v22 }
 0x41d   : > { %861 = vmatmul.mubr.msk.bf16.vlgmr.msra.gmra.mxu0 %vm204_vm1, %v512_v23 }
 0x41e   : > { %872 = vmatprep.mubr.msk.bf16.mxu0 %vm926_vm0, %v925_v0 }
 0x437   : > { %v637_v24 = vpop.xlane.xlu1 %636 }
 0x438   : > { %915 = vrcp.f32 %v637_v24 }
 0x43b   : > { %v646_v25 = vpop.permute.xlu1 %645 }
 0x43c   : > { %v651_v26 = vsel %vm267_vm2, %v646_v25, 0 }
 0x43d   : > { %871 = vmatpush3.bf16.msra.mxu0 %v651_v26 }
 0x445   : > { %v916_v28 = vpop.eup %915 }
 0x446   : > { %v640_v29 = vmul.f32 %v916_v28, %v807_v27 }
 0x448   : > { %v641_v30 = vpack.c.bf16 %v640_v29, %v640_v29 }
 0x44a   : > { %873 = vmatmul.mubr.msk.bf16.vlgmr.msra.gmra.mxu0 %vm204_vm1, %v641_v30 }
 0x4d5   : > { %v429_v31 = vpop.f32.mrf.mxu0 }
 0x4d6   : > { %436 = vrot.lane.b32.xlu0 %v429_v31, %s930_s27 }
 0x4d7   : > { %v850_v32 = vpop.f32.mrf.mxu0 }
 0x4d9   : > { %v432_v33 = vpop.f32.mrf.mxu0 }
 0x4db   : > { %v851_v34 = vpop.f32.mrf.mxu0 }
 0x4dd   : > { %v558_v35 = vpop.f32.mrf.mxu0 }
 0x4de   : > { %565 = vrot.lane.b32.xlu1 %v558_v35, %s931_s28 }
 0x4df   : > { %v862_v0 = vpop.f32.mrf.mxu0 }
 0x4e1   : > { %v561_v36 = vpop.f32.mrf.mxu0 }
 0x4e3   : > { %v863_v37 = vpop.f32.mrf.mxu0 }
 0x50a   : > { %v687_v38 = vpop.f32.mrf.mxu0 }
 0x50b   : > { %694 = vrot.lane.b32.xlu0 %v687_v38, %s932_s29 }
 0x50c   : > { %v874_v39 = vpop.f32.mrf.mxu0 }
 0x50e   : > { %v690_v40 = vpop.f32.mrf.mxu0 }
 0x510   : > { %v875_v41 = vpop.f32.mrf.mxu0 }
 0x548   : > { %v437_v42 = vpop.permute.xlu0 %436 }
 0x549   : > { %440 = vst.msk [vmem:[#allocation2] sm:$0xff] %vm439_vm3, %v437_v42 }
 0x550   : > { %v566_v43 = vpop.permute.xlu1 %565 }
 0x551   : > { %569 = vst.msk [vmem:[#allocation2] sm:$0xff] %vm568_vm4, %v566_v43 }
 0x57d   : > { %v695_v44 = vpop.permute.xlu0 %694 }
 0x57e   : > { %698 = vst.msk [vmem:[#allocation2] sm:$0xff] %vm697_vm5, %v695_v44 }
 0x585   : > { %v699_v45 = vld [vmem:[#allocation2] sm:$0xff] }
 0x586   : > { %v700_v46 = vpack.c.bf16 %v699_v45, %v699_v45 }
 0x588   : > { %702 = vst.msk [vmem:[%s199_s5] sm:$0xf] %vm701_vm6, %v700_v46 }
 0x589 PF: > { %s13_s12 = sadd.s32 1, %s923_s12  }
 0x58a   : > { %p10_p4 = scmp.ge.s32.totalorder %s13_s12, 4  }
 0x58c   :  { %12 = sbr.rel (!%p10_p4) target bundleno = 1 (0x1), region = 68 }

</bundles_post_ra>
